<compile_context>
chip_gen: v7x
topology: tpu7x:2x2x1
jax: 0.10.0
libtpu: 0.0.40
codegen_flags: <defaults>
</compile_context>

<pallas_src>
import math
import functools

import jax
import jax.numpy as jnp
from jax import lax
from jax.experimental import pallas as pl
from jax.experimental.pallas import tpu as pltpu


def _gelu_exact(x):
    # nn.GELU() default (approximate='none'): 0.5*x*(1+erf(x/sqrt(2)))
    return 0.5 * x * (1.0 + lax.erf(x / jnp.sqrt(2.0).astype(x.dtype)))


def self_attention_kernel(x_ref, w_ref, b_ref, o_ref, *, n_heads, att_dim, batch, seq):
    H, d, B, S = n_heads, att_dim, batch, seq

    # ---- Full-width projections: one MXU pass over all B*S rows each. ----
    # x_ref: (3, B*S, E)   [0]=xq, [1]=xk, [2]=xv
    # w_ref: (4, E, E)     [0]=Wq^T * 1/sqrt(d), [1]=Wk^T, [2]=Wv^T, [3]=Wout^T
    # b_ref: (4, 1, E)     [0]=bq * 1/sqrt(d),   [1]=bk,   [2]=bv,   [3]=bout
    q = jnp.dot(x_ref[0], w_ref[0], preferred_element_type=jnp.float32) + b_ref[0]
    k = jnp.dot(x_ref[1], w_ref[1], preferred_element_type=jnp.float32) + b_ref[1]
    v = jnp.dot(x_ref[2], w_ref[2], preferred_element_type=jnp.float32) + b_ref[2]

    # ---- Regroup to per-head (H, B*S, d): static lane slices + stack (XLU). ----
    def split_heads(t):  # (B*S, E) -> (H, B*S, d)
        return jnp.stack([t[:, h * d:(h + 1) * d] for h in range(H)], axis=0)

    qh, kh, vh = split_heads(q), split_heads(k), split_heads(v)

    # ---- Attention: batched over heads, static unroll over the tiny batch. ----
    ctx_rows = []
    for b in range(B):
        rows = slice(b * S, (b + 1) * S)
        qb, kb, vb = qh[:, rows], kh[:, rows], vh[:, rows]       # (H, S, d)
        s = jnp.einsum('hsd,htd->hst', qb, kb,
                       preferred_element_type=jnp.float32)       # (H, S, S)
        m = jnp.max(s, axis=-1, keepdims=True)
        p = jnp.exp(s - m)                                       # unnormalized
        l = jnp.sum(p, axis=-1, keepdims=True)                   # (H, S, 1)
        ctx = jnp.einsum('hst,htd->hsd', p, vb,
                         preferred_element_type=jnp.float32)     # (H, S, d)
        # Deferred softmax normalization on the (S,d) context (exact reciprocal).
        ctx = ctx * (1.0 / l)
        # Lane-concat heads back to a dense (S, E) slab.
        ctx_rows.append(jnp.concatenate([ctx[h] for h in range(H)], axis=-1))
    res = jnp.concatenate(ctx_rows, axis=0)                      # (B*S, E)

    # ---- Single full-width output projection + bias + exact erf-GELU. ----
    out = jnp.dot(res, w_ref[3], preferred_element_type=jnp.float32) + b_ref[3]
    o_ref[...] = _gelu_exact(out).astype(o_ref.dtype)


def self_attention(xv, xk, xq, params, n_heads):
    B, S, E = xq.shape
    assert E % n_heads == 0
    d = E // n_heads
    wq, bq, wk, bk, wv, bv, wo, bo = params
    inv_norm = jnp.float32(1.0 / math.sqrt(d))

    # Pack everything into 3 DMA operands (free XLA prep, outside the kernel).
    # PyTorch Linear computes x @ W.T + b, so stash W.T; fold 1/sqrt(d) into Q.
    w_stack = jnp.stack([wq.T * inv_norm, wk.T, wv.T, wo.T], axis=0)        # (4,E,E)
    b_stack = jnp.stack([bq * inv_norm, bk, bv, bo], axis=0).reshape(4, 1, E)
    x_stack = jnp.stack([xq.reshape(B * S, E),
                         xk.reshape(B * S, E),
                         xv.reshape(B * S, E)], axis=0)                      # (3,B*S,E)

    kernel = functools.partial(self_attention_kernel,
                               n_heads=n_heads, att_dim=d, batch=B, seq=S)

    # Advisory cost estimate so XLA schedules/overlaps this tiny call sensibly.
    flops = 8 * B * S * E * E + 4 * B * n_heads * S * S * d
    transcendentals = B * n_heads * S * S + B * S * E
    bytes_accessed = 4 * (4 * B * S * E + 4 * E * E + 4 * E)
    cost = pl.CostEstimate(flops=flops, transcendentals=transcendentals,
                           bytes_accessed=bytes_accessed)

    out = pl.pallas_call(
        kernel,
        out_shape=jax.ShapeDtypeStruct((B * S, E), jnp.float32),
        grid=(1,),  # single step on every generation; no B=2 megacore split
        in_specs=[pl.BlockSpec((3, B * S, E), lambda i: (0, 0, 0)),
                  pl.BlockSpec((4, E, E), lambda i: (0, 0, 0)),
                  pl.BlockSpec((4, 1, E), lambda i: (0, 0, 0))],
        out_specs=pl.BlockSpec((B * S, E), lambda i: (0, 0)),
        compiler_params=pltpu.CompilerParams(
            dimension_semantics=("arbitrary",)),
        cost_estimate=cost,
    )(x_stack, w_stack, b_stack)
    return out.reshape(B, S, E)


def self_attention_ref(xv, xk, xq, params, n_heads):
    """Plain-JAX reference mirroring the PyTorch forward (eval mode)."""
    wq, bq, wk, bk, wv, bv, wo, bo = params
    B, S, E = xq.shape
    d = E // n_heads
    Q = xq @ wq.T + bq
    K = xk @ wk.T + bk
    V = xv @ wv.T + bv
    outs = []
    for h in range(n_heads):
        sl = slice(h * d, (h + 1) * d)
        scores = (Q[:, :, sl] @ jnp.swapaxes(K[:, :, sl], 1, 2)) / math.sqrt(d)
        p = jax.nn.softmax(scores, axis=2)
        outs.append(p @ V[:, :, sl])
    res = jnp.concatenate(outs, axis=-1)
    out = res @ wo.T + bo
    return 0.5 * out * (1.0 + lax.erf(out / jnp.sqrt(2.0)))


if __name__ == "__main__":
    B, S, E, H = 2, 8, 32, 8   # batch, seq, emb_dim, n_heads -> att_dim = 4

    key = jax.random.PRNGKey(0)
    keys = jax.random.split(key, 12)
    scale = 0.1
    wq = scale * jax.random.normal(keys[0], (E, E), jnp.float32)
    bq = scale * jax.random.normal(keys[1], (E,), jnp.float32)
    wk = scale * jax.random.normal(keys[2], (E, E), jnp.float32)
    bk = scale * jax.random.normal(keys[3], (E,), jnp.float32)
    wv = scale * jax.random.normal(keys[4], (E, E), jnp.float32)
    bv = scale * jax.random.normal(keys[5], (E,), jnp.float32)
    wo = scale * jax.random.normal(keys[6], (E, E), jnp.float32)
    bo = scale * jax.random.normal(keys[7], (E,), jnp.float32)
    params = (wq, bq, wk, bk, wv, bv, wo, bo)

    xv = jax.random.normal(keys[8], (B, S, E), jnp.float32)
    xk = jax.random.normal(keys[9], (B, S, E), jnp.float32)
    xq = jax.random.normal(keys[10], (B, S, E), jnp.float32)

    out = self_attention(xv, xk, xq, params, H)
    out = jax.block_until_ready(out)

    ref = self_attention_ref(xv, xk, xq, params, H)
    assert out.shape == (B, S, E)
    assert jnp.allclose(out, ref, atol=2e-5, rtol=2e-5), "mismatch vs reference"

    print("KERNEL_OK")
</pallas_src>

<mosaic_0001>
module attributes {stable_mosaic.version = 11 : i64} {
  func.func @self_attention_kernel(%arg0: i32, %arg1: memref<3x16x32xf32, #tpu.memory_space<vmem>>, %arg2: memref<4x32x32xf32, #tpu.memory_space<vmem>>, %arg3: memref<4x1x32xf32, #tpu.memory_space<vmem>>, %arg4: memref<16x32xf32, #tpu.memory_space<vmem>>) attributes {dimension_semantics = [#tpu.dimension_semantics<arbitrary>], iteration_bounds = array<i64: 1>, scalar_prefetch = 0 : i64, scratch_operands = 0 : i64, tpu.core_type = #tpu.core_type<tc>, window_params = [{pipeline_mode = #tpu.pipeline_mode<synchronous>, transform_indices = @transform_0, window_bounds = array<i64: 3, 16, 32>}, {pipeline_mode = #tpu.pipeline_mode<synchronous>, transform_indices = @transform_1, window_bounds = array<i64: 4, 32, 32>}, {pipeline_mode = #tpu.pipeline_mode<synchronous>, transform_indices = @transform_2, window_bounds = array<i64: 4, 1, 32>}, {pipeline_mode = #tpu.pipeline_mode<synchronous>, transform_indices = @transform_3, window_bounds = array<i64: 16, 32>}]} {
    %c0 = arith.constant 0 : index
    %c0_0 = arith.constant 0 : index
    %c0_1 = arith.constant 0 : index
    %0 = vector.load %arg1[%c0, %c0_0, %c0_1] : memref<3x16x32xf32, #tpu.memory_space<vmem>>, vector<1x16x32xf32>
    %1 = vector.shape_cast %0 : vector<1x16x32xf32> to vector<16x32xf32>
    %c0_2 = arith.constant 0 : index
    %c0_3 = arith.constant 0 : index
    %c0_4 = arith.constant 0 : index
    %2 = vector.load %arg2[%c0_2, %c0_3, %c0_4] : memref<4x32x32xf32, #tpu.memory_space<vmem>>, vector<1x32x32xf32>
    %3 = vector.shape_cast %2 : vector<1x32x32xf32> to vector<32x32xf32>
    %cst = arith.constant dense<0.000000e+00> : vector<16x32xf32>
    %4 = tpu.matmul %1, %3, %cst {dimension_numbers = #tpu.dot_dimension_numbers<[1], [0], [0], [1], [0, 0, 1, 1], [], []>} : vector<16x32xf32>, vector<32x32xf32>, vector<16x32xf32> -> vector<16x32xf32>
    %c0_5 = arith.constant 0 : index
    %c0_6 = arith.constant 0 : index
    %c0_7 = arith.constant 0 : index
    %5 = vector.load %arg3[%c0_5, %c0_6, %c0_7] : memref<4x1x32xf32, #tpu.memory_space<vmem>>, vector<1x1x32xf32>
    %6 = vector.shape_cast %5 : vector<1x1x32xf32> to vector<1x32xf32>
    %7 = vector.broadcast %6 : vector<1x32xf32> to vector<16x32xf32>
    %8 = arith.addf %4, %7 : vector<16x32xf32>
    %c1 = arith.constant 1 : index
    %c0_8 = arith.constant 0 : index
    %c0_9 = arith.constant 0 : index
    %9 = vector.load %arg1[%c1, %c0_8, %c0_9] : memref<3x16x32xf32, #tpu.memory_space<vmem>>, vector<1x16x32xf32>
    %10 = vector.shape_cast %9 : vector<1x16x32xf32> to vector<16x32xf32>
    %c1_10 = arith.constant 1 : index
    %c0_11 = arith.constant 0 : index
    %c0_12 = arith.constant 0 : index
    %11 = vector.load %arg2[%c1_10, %c0_11, %c0_12] : memref<4x32x32xf32, #tpu.memory_space<vmem>>, vector<1x32x32xf32>
    %12 = vector.shape_cast %11 : vector<1x32x32xf32> to vector<32x32xf32>
    %cst_13 = arith.constant dense<0.000000e+00> : vector<16x32xf32>
    %13 = tpu.matmul %10, %12, %cst_13 {dimension_numbers = #tpu.dot_dimension_numbers<[1], [0], [0], [1], [0, 0, 1, 1], [], []>} : vector<16x32xf32>, vector<32x32xf32>, vector<16x32xf32> -> vector<16x32xf32>
    %c1_14 = arith.constant 1 : index
    %c0_15 = arith.constant 0 : index
    %c0_16 = arith.constant 0 : index
    %14 = vector.load %arg3[%c1_14, %c0_15, %c0_16] : memref<4x1x32xf32, #tpu.memory_space<vmem>>, vector<1x1x32xf32>
    %15 = vector.shape_cast %14 : vector<1x1x32xf32> to vector<1x32xf32>
    %16 = vector.broadcast %15 : vector<1x32xf32> to vector<16x32xf32>
    %17 = arith.addf %13, %16 : vector<16x32xf32>
    %c2 = arith.constant 2 : index
    %c0_17 = arith.constant 0 : index
    %c0_18 = arith.constant 0 : index
    %18 = vector.load %arg1[%c2, %c0_17, %c0_18] : memref<3x16x32xf32, #tpu.memory_space<vmem>>, vector<1x16x32xf32>
    %19 = vector.shape_cast %18 : vector<1x16x32xf32> to vector<16x32xf32>
    %c2_19 = arith.constant 2 : index
    %c0_20 = arith.constant 0 : index
    %c0_21 = arith.constant 0 : index
    %20 = vector.load %arg2[%c2_19, %c0_20, %c0_21] : memref<4x32x32xf32, #tpu.memory_space<vmem>>, vector<1x32x32xf32>
    %21 = vector.shape_cast %20 : vector<1x32x32xf32> to vector<32x32xf32>
    %cst_22 = arith.constant dense<0.000000e+00> : vector<16x32xf32>
    %22 = tpu.matmul %19, %21, %cst_22 {dimension_numbers = #tpu.dot_dimension_numbers<[1], [0], [0], [1], [0, 0, 1, 1], [], []>} : vector<16x32xf32>, vector<32x32xf32>, vector<16x32xf32> -> vector<16x32xf32>
    %c2_23 = arith.constant 2 : index
    %c0_24 = arith.constant 0 : index
    %c0_25 = arith.constant 0 : index
    %23 = vector.load %arg3[%c2_23, %c0_24, %c0_25] : memref<4x1x32xf32, #tpu.memory_space<vmem>>, vector<1x1x32xf32>
    %24 = vector.shape_cast %23 : vector<1x1x32xf32> to vector<1x32xf32>
    %25 = vector.broadcast %24 : vector<1x32xf32> to vector<16x32xf32>
    %26 = arith.addf %22, %25 : vector<16x32xf32>
    %27 = vector.extract_strided_slice %8 {offsets = [0, 0], sizes = [16, 4], strides = [1, 1]} : vector<16x32xf32> to vector<16x4xf32>
    %28 = vector.extract_strided_slice %8 {offsets = [0, 4], sizes = [16, 4], strides = [1, 1]} : vector<16x32xf32> to vector<16x4xf32>
    %29 = vector.extract_strided_slice %8 {offsets = [0, 8], sizes = [16, 4], strides = [1, 1]} : vector<16x32xf32> to vector<16x4xf32>
    %30 = vector.extract_strided_slice %8 {offsets = [0, 12], sizes = [16, 4], strides = [1, 1]} : vector<16x32xf32> to vector<16x4xf32>
    %31 = vector.extract_strided_slice %8 {offsets = [0, 16], sizes = [16, 4], strides = [1, 1]} : vector<16x32xf32> to vector<16x4xf32>
    %32 = vector.extract_strided_slice %8 {offsets = [0, 20], sizes = [16, 4], strides = [1, 1]} : vector<16x32xf32> to vector<16x4xf32>
    %33 = vector.extract_strided_slice %8 {offsets = [0, 24], sizes = [16, 4], strides = [1, 1]} : vector<16x32xf32> to vector<16x4xf32>
    %34 = vector.extract_strided_slice %8 {offsets = [0, 28], sizes = [16, 4], strides = [1, 1]} : vector<16x32xf32> to vector<16x4xf32>
    %35 = vector.shape_cast %27 : vector<16x4xf32> to vector<1x16x4xf32>
    %36 = vector.shape_cast %28 : vector<16x4xf32> to vector<1x16x4xf32>
    %37 = vector.shape_cast %29 : vector<16x4xf32> to vector<1x16x4xf32>
    %38 = vector.shape_cast %30 : vector<16x4xf32> to vector<1x16x4xf32>
    %39 = vector.shape_cast %31 : vector<16x4xf32> to vector<1x16x4xf32>
    %40 = vector.shape_cast %32 : vector<16x4xf32> to vector<1x16x4xf32>
    %41 = vector.shape_cast %33 : vector<16x4xf32> to vector<1x16x4xf32>
    %42 = vector.shape_cast %34 : vector<16x4xf32> to vector<1x16x4xf32>
    %43 = tpu.concatenate %35, %36, %37, %38, %39, %40, %41, %42 in 0 : vector<1x16x4xf32>, vector<1x16x4xf32>, vector<1x16x4xf32>, vector<1x16x4xf32>, vector<1x16x4xf32>, vector<1x16x4xf32>, vector<1x16x4xf32>, vector<1x16x4xf32> -> vector<8x16x4xf32>
    %44 = vector.extract_strided_slice %17 {offsets = [0, 0], sizes = [16, 4], strides = [1, 1]} : vector<16x32xf32> to vector<16x4xf32>
    %45 = vector.extract_strided_slice %17 {offsets = [0, 4], sizes = [16, 4], strides = [1, 1]} : vector<16x32xf32> to vector<16x4xf32>
    %46 = vector.extract_strided_slice %17 {offsets = [0, 8], sizes = [16, 4], strides = [1, 1]} : vector<16x32xf32> to vector<16x4xf32>
    %47 = vector.extract_strided_slice %17 {offsets = [0, 12], sizes = [16, 4], strides = [1, 1]} : vector<16x32xf32> to vector<16x4xf32>
    %48 = vector.extract_strided_slice %17 {offsets = [0, 16], sizes = [16, 4], strides = [1, 1]} : vector<16x32xf32> to vector<16x4xf32>
    %49 = vector.extract_strided_slice %17 {offsets = [0, 20], sizes = [16, 4], strides = [1, 1]} : vector<16x32xf32> to vector<16x4xf32>
    %50 = vector.extract_strided_slice %17 {offsets = [0, 24], sizes = [16, 4], strides = [1, 1]} : vector<16x32xf32> to vector<16x4xf32>
    %51 = vector.extract_strided_slice %17 {offsets = [0, 28], sizes = [16, 4], strides = [1, 1]} : vector<16x32xf32> to vector<16x4xf32>
    %52 = vector.shape_cast %44 : vector<16x4xf32> to vector<1x16x4xf32>
    %53 = vector.shape_cast %45 : vector<16x4xf32> to vector<1x16x4xf32>
    %54 = vector.shape_cast %46 : vector<16x4xf32> to vector<1x16x4xf32>
    %55 = vector.shape_cast %47 : vector<16x4xf32> to vector<1x16x4xf32>
    %56 = vector.shape_cast %48 : vector<16x4xf32> to vector<1x16x4xf32>
    %57 = vector.shape_cast %49 : vector<16x4xf32> to vector<1x16x4xf32>
    %58 = vector.shape_cast %50 : vector<16x4xf32> to vector<1x16x4xf32>
    %59 = vector.shape_cast %51 : vector<16x4xf32> to vector<1x16x4xf32>
    %60 = tpu.concatenate %52, %53, %54, %55, %56, %57, %58, %59 in 0 : vector<1x16x4xf32>, vector<1x16x4xf32>, vector<1x16x4xf32>, vector<1x16x4xf32>, vector<1x16x4xf32>, vector<1x16x4xf32>, vector<1x16x4xf32>, vector<1x16x4xf32> -> vector<8x16x4xf32>
    %61 = vector.extract_strided_slice %26 {offsets = [0, 0], sizes = [16, 4], strides = [1, 1]} : vector<16x32xf32> to vector<16x4xf32>
    %62 = vector.extract_strided_slice %26 {offsets = [0, 4], sizes = [16, 4], strides = [1, 1]} : vector<16x32xf32> to vector<16x4xf32>
    %63 = vector.extract_strided_slice %26 {offsets = [0, 8], sizes = [16, 4], strides = [1, 1]} : vector<16x32xf32> to vector<16x4xf32>
    %64 = vector.extract_strided_slice %26 {offsets = [0, 12], sizes = [16, 4], strides = [1, 1]} : vector<16x32xf32> to vector<16x4xf32>
    %65 = vector.extract_strided_slice %26 {offsets = [0, 16], sizes = [16, 4], strides = [1, 1]} : vector<16x32xf32> to vector<16x4xf32>
    %66 = vector.extract_strided_slice %26 {offsets = [0, 20], sizes = [16, 4], strides = [1, 1]} : vector<16x32xf32> to vector<16x4xf32>
    %67 = vector.extract_strided_slice %26 {offsets = [0, 24], sizes = [16, 4], strides = [1, 1]} : vector<16x32xf32> to vector<16x4xf32>
    %68 = vector.extract_strided_slice %26 {offsets = [0, 28], sizes = [16, 4], strides = [1, 1]} : vector<16x32xf32> to vector<16x4xf32>
    %69 = vector.shape_cast %61 : vector<16x4xf32> to vector<1x16x4xf32>
    %70 = vector.shape_cast %62 : vector<16x4xf32> to vector<1x16x4xf32>
    %71 = vector.shape_cast %63 : vector<16x4xf32> to vector<1x16x4xf32>
    %72 = vector.shape_cast %64 : vector<16x4xf32> to vector<1x16x4xf32>
    %73 = vector.shape_cast %65 : vector<16x4xf32> to vector<1x16x4xf32>
    %74 = vector.shape_cast %66 : vector<16x4xf32> to vector<1x16x4xf32>
    %75 = vector.shape_cast %67 : vector<16x4xf32> to vector<1x16x4xf32>
    %76 = vector.shape_cast %68 : vector<16x4xf32> to vector<1x16x4xf32>
    %77 = tpu.concatenate %69, %70, %71, %72, %73, %74, %75, %76 in 0 : vector<1x16x4xf32>, vector<1x16x4xf32>, vector<1x16x4xf32>, vector<1x16x4xf32>, vector<1x16x4xf32>, vector<1x16x4xf32>, vector<1x16x4xf32>, vector<1x16x4xf32> -> vector<8x16x4xf32>
    %78 = vector.extract_strided_slice %43 {offsets = [0, 0, 0], sizes = [8, 8, 4], strides = [1, 1, 1]} : vector<8x16x4xf32> to vector<8x8x4xf32>
    %79 = vector.extract_strided_slice %60 {offsets = [0, 0, 0], sizes = [8, 8, 4], strides = [1, 1, 1]} : vector<8x16x4xf32> to vector<8x8x4xf32>
    %80 = vector.extract_strided_slice %77 {offsets = [0, 0, 0], sizes = [8, 8, 4], strides = [1, 1, 1]} : vector<8x16x4xf32> to vector<8x8x4xf32>
    "tpu.trace_start"() <{level = 10 : i32, message = "hsd,htd->hst"}> : () -> ()
    %cst_26 = arith.constant dense<0.000000e+00> : vector<8x8x8xf32>
    %81 = tpu.matmul %78, %79, %cst_26 {dimension_numbers = #tpu.dot_dimension_numbers<[2], [2], [1], [1], [0, 0, 0, 1, 1, 1], [0], [0]>} : vector<8x8x4xf32>, vector<8x8x4xf32>, vector<8x8x8xf32> -> vector<8x8x8xf32>
    "tpu.trace_stop"() : () -> ()
    %cst_27 = arith.constant dense<0xFF800000> : vector<8x8xf32>
    %82 = vector.multi_reduction <maximumf>, %81, %cst_27 [2] : vector<8x8x8xf32> to vector<8x8xf32>
    %83 = vector.shape_cast %82 : vector<8x8xf32> to vector<8x8x1xf32>
    %84 = vector.broadcast %83 : vector<8x8x1xf32> to vector<8x8x8xf32>
    %85 = arith.subf %81, %84 : vector<8x8x8xf32>
    %86 = math.exp %85 : vector<8x8x8xf32>
    %cst_28 = arith.constant dense<0.000000e+00> : vector<8x8xf32>
    %87 = vector.multi_reduction <add>, %86, %cst_28 [2] : vector<8x8x8xf32> to vector<8x8xf32>
    %88 = vector.shape_cast %87 : vector<8x8xf32> to vector<8x8x1xf32>
    "tpu.trace_start"() <{level = 10 : i32, message = "hst,htd->hsd"}> : () -> ()
    %cst_29 = arith.constant dense<0.000000e+00> : vector<8x8x4xf32>
    %89 = tpu.matmul %86, %80, %cst_29 {dimension_numbers = #tpu.dot_dimension_numbers<[2], [1], [1], [2], [0, 0, 0, 1, 1, 2], [0], [0]>} : vector<8x8x8xf32>, vector<8x8x4xf32>, vector<8x8x4xf32> -> vector<8x8x4xf32>
    "tpu.trace_stop"() : () -> ()
    %cst_30 = arith.constant 1.000000e+00 : f32
    %90 = vector.broadcast %cst_30 : f32 to vector<8x8x1xf32>
    %91 = arith.divf %90, %88 : vector<8x8x1xf32>
    %92 = vector.broadcast %91 : vector<8x8x1xf32> to vector<8x8x4xf32>
    %93 = arith.mulf %89, %92 : vector<8x8x4xf32>
    %94 = vector.extract_strided_slice %93 {offsets = [0, 0, 0], sizes = [1, 8, 4], strides = [1, 1, 1]} : vector<8x8x4xf32> to vector<1x8x4xf32>
    %95 = vector.shape_cast %94 : vector<1x8x4xf32> to vector<8x4xf32>
    %96 = vector.extract_strided_slice %93 {offsets = [1, 0, 0], sizes = [1, 8, 4], strides = [1, 1, 1]} : vector<8x8x4xf32> to vector<1x8x4xf32>
    %97 = vector.shape_cast %96 : vector<1x8x4xf32> to vector<8x4xf32>
    %98 = vector.extract_strided_slice %93 {offsets = [2, 0, 0], sizes = [1, 8, 4], strides = [1, 1, 1]} : vector<8x8x4xf32> to vector<1x8x4xf32>
    %99 = vector.shape_cast %98 : vector<1x8x4xf32> to vector<8x4xf32>
    %100 = vector.extract_strided_slice %93 {offsets = [3, 0, 0], sizes = [1, 8, 4], strides = [1, 1, 1]} : vector<8x8x4xf32> to vector<1x8x4xf32>
    %101 = vector.shape_cast %100 : vector<1x8x4xf32> to vector<8x4xf32>
    %102 = vector.extract_strided_slice %93 {offsets = [4, 0, 0], sizes = [1, 8, 4], strides = [1, 1, 1]} : vector<8x8x4xf32> to vector<1x8x4xf32>
    %103 = vector.shape_cast %102 : vector<1x8x4xf32> to vector<8x4xf32>
    %104 = vector.extract_strided_slice %93 {offsets = [5, 0, 0], sizes = [1, 8, 4], strides = [1, 1, 1]} : vector<8x8x4xf32> to vector<1x8x4xf32>
    %105 = vector.shape_cast %104 : vector<1x8x4xf32> to vector<8x4xf32>
    %106 = vector.extract_strided_slice %93 {offsets = [6, 0, 0], sizes = [1, 8, 4], strides = [1, 1, 1]} : vector<8x8x4xf32> to vector<1x8x4xf32>
    %107 = vector.shape_cast %106 : vector<1x8x4xf32> to vector<8x4xf32>
    %108 = vector.extract_strided_slice %93 {offsets = [7, 0, 0], sizes = [1, 8, 4], strides = [1, 1, 1]} : vector<8x8x4xf32> to vector<1x8x4xf32>
    %109 = vector.shape_cast %108 : vector<1x8x4xf32> to vector<8x4xf32>
    %110 = tpu.concatenate %95, %97, %99, %101, %103, %105, %107, %109 in 1 : vector<8x4xf32>, vector<8x4xf32>, vector<8x4xf32>, vector<8x4xf32>, vector<8x4xf32>, vector<8x4xf32>, vector<8x4xf32>, vector<8x4xf32> -> vector<8x32xf32>
    %111 = vector.extract_strided_slice %43 {offsets = [0, 8, 0], sizes = [8, 8, 4], strides = [1, 1, 1]} : vector<8x16x4xf32> to vector<8x8x4xf32>
    %112 = vector.extract_strided_slice %60 {offsets = [0, 8, 0], sizes = [8, 8, 4], strides = [1, 1, 1]} : vector<8x16x4xf32> to vector<8x8x4xf32>
    %113 = vector.extract_strided_slice %77 {offsets = [0, 8, 0], sizes = [8, 8, 4], strides = [1, 1, 1]} : vector<8x16x4xf32> to vector<8x8x4xf32>
    "tpu.trace_start"() <{level = 10 : i32, message = "hsd,htd->hst"}> : () -> ()
    %cst_31 = arith.constant dense<0.000000e+00> : vector<8x8x8xf32>
    %114 = tpu.matmul %111, %112, %cst_31 {dimension_numbers = #tpu.dot_dimension_numbers<[2], [2], [1], [1], [0, 0, 0, 1, 1, 1], [0], [0]>} : vector<8x8x4xf32>, vector<8x8x4xf32>, vector<8x8x8xf32> -> vector<8x8x8xf32>
    "tpu.trace_stop"() : () -> ()
    %cst_32 = arith.constant dense<0xFF800000> : vector<8x8xf32>
    %115 = vector.multi_reduction <maximumf>, %114, %cst_32 [2] : vector<8x8x8xf32> to vector<8x8xf32>
    %116 = vector.shape_cast %115 : vector<8x8xf32> to vector<8x8x1xf32>
    %117 = vector.broadcast %116 : vector<8x8x1xf32> to vector<8x8x8xf32>
    %118 = arith.subf %114, %117 : vector<8x8x8xf32>
    %119 = math.exp %118 : vector<8x8x8xf32>
    %cst_33 = arith.constant dense<0.000000e+00> : vector<8x8xf32>
    %120 = vector.multi_reduction <add>, %119, %cst_33 [2] : vector<8x8x8xf32> to vector<8x8xf32>
    %121 = vector.shape_cast %120 : vector<8x8xf32> to vector<8x8x1xf32>
    "tpu.trace_start"() <{level = 10 : i32, message = "hst,htd->hsd"}> : () -> ()
    %cst_34 = arith.constant dense<0.000000e+00> : vector<8x8x4xf32>
    %122 = tpu.matmul %119, %113, %cst_34 {dimension_numbers = #tpu.dot_dimension_numbers<[2], [1], [1], [2], [0, 0, 0, 1, 1, 2], [0], [0]>} : vector<8x8x8xf32>, vector<8x8x4xf32>, vector<8x8x4xf32> -> vector<8x8x4xf32>
    "tpu.trace_stop"() : () -> ()
    %cst_35 = arith.constant 1.000000e+00 : f32
    %123 = vector.broadcast %cst_35 : f32 to vector<8x8x1xf32>
    %124 = arith.divf %123, %121 : vector<8x8x1xf32>
    %125 = vector.broadcast %124 : vector<8x8x1xf32> to vector<8x8x4xf32>
    %126 = arith.mulf %122, %125 : vector<8x8x4xf32>
    %127 = vector.extract_strided_slice %126 {offsets = [0, 0, 0], sizes = [1, 8, 4], strides = [1, 1, 1]} : vector<8x8x4xf32> to vector<1x8x4xf32>
    %128 = vector.shape_cast %127 : vector<1x8x4xf32> to vector<8x4xf32>
    %129 = vector.extract_strided_slice %126 {offsets = [1, 0, 0], sizes = [1, 8, 4], strides = [1, 1, 1]} : vector<8x8x4xf32> to vector<1x8x4xf32>
    %130 = vector.shape_cast %129 : vector<1x8x4xf32> to vector<8x4xf32>
    %131 = vector.extract_strided_slice %126 {offsets = [2, 0, 0], sizes = [1, 8, 4], strides = [1, 1, 1]} : vector<8x8x4xf32> to vector<1x8x4xf32>
    %132 = vector.shape_cast %131 : vector<1x8x4xf32> to vector<8x4xf32>
    %133 = vector.extract_strided_slice %126 {offsets = [3, 0, 0], sizes = [1, 8, 4], strides = [1, 1, 1]} : vector<8x8x4xf32> to vector<1x8x4xf32>
    %134 = vector.shape_cast %133 : vector<1x8x4xf32> to vector<8x4xf32>
    %135 = vector.extract_strided_slice %126 {offsets = [4, 0, 0], sizes = [1, 8, 4], strides = [1, 1, 1]} : vector<8x8x4xf32> to vector<1x8x4xf32>
    %136 = vector.shape_cast %135 : vector<1x8x4xf32> to vector<8x4xf32>
    %137 = vector.extract_strided_slice %126 {offsets = [5, 0, 0], sizes = [1, 8, 4], strides = [1, 1, 1]} : vector<8x8x4xf32> to vector<1x8x4xf32>
    %138 = vector.shape_cast %137 : vector<1x8x4xf32> to vector<8x4xf32>
    %139 = vector.extract_strided_slice %126 {offsets = [6, 0, 0], sizes = [1, 8, 4], strides = [1, 1, 1]} : vector<8x8x4xf32> to vector<1x8x4xf32>
    %140 = vector.shape_cast %139 : vector<1x8x4xf32> to vector<8x4xf32>
    %141 = vector.extract_strided_slice %126 {offsets = [7, 0, 0], sizes = [1, 8, 4], strides = [1, 1, 1]} : vector<8x8x4xf32> to vector<1x8x4xf32>
    %142 = vector.shape_cast %141 : vector<1x8x4xf32> to vector<8x4xf32>
    %143 = tpu.concatenate %128, %130, %132, %134, %136, %138, %140, %142 in 1 : vector<8x4xf32>, vector<8x4xf32>, vector<8x4xf32>, vector<8x4xf32>, vector<8x4xf32>, vector<8x4xf32>, vector<8x4xf32>, vector<8x4xf32> -> vector<8x32xf32>
    %144 = tpu.concatenate %110, %143 in 0 : vector<8x32xf32>, vector<8x32xf32> -> vector<16x32xf32>
    %c3 = arith.constant 3 : index
    %c0_36 = arith.constant 0 : index
    %c0_37 = arith.constant 0 : index
    %145 = vector.load %arg2[%c3, %c0_36, %c0_37] : memref<4x32x32xf32, #tpu.memory_space<vmem>>, vector<1x32x32xf32>
    %146 = vector.shape_cast %145 : vector<1x32x32xf32> to vector<32x32xf32>
    %cst_38 = arith.constant dense<0.000000e+00> : vector<16x32xf32>
    %147 = tpu.matmul %144, %146, %cst_38 {dimension_numbers = #tpu.dot_dimension_numbers<[1], [0], [0], [1], [0, 0, 1, 1], [], []>} : vector<16x32xf32>, vector<32x32xf32>, vector<16x32xf32> -> vector<16x32xf32>
    %c3_39 = arith.constant 3 : index
    %c0_40 = arith.constant 0 : index
    %c0_41 = arith.constant 0 : index
    %148 = vector.load %arg3[%c3_39, %c0_40, %c0_41] : memref<4x1x32xf32, #tpu.memory_space<vmem>>, vector<1x1x32xf32>
    %149 = vector.shape_cast %148 : vector<1x1x32xf32> to vector<1x32xf32>
    %150 = vector.broadcast %149 : vector<1x32xf32> to vector<16x32xf32>
    %151 = arith.addf %147, %150 : vector<16x32xf32>
    %cst_42 = arith.constant 5.000000e-01 : f32
    %152 = vector.broadcast %cst_42 : f32 to vector<16x32xf32>
    %153 = arith.mulf %152, %151 : vector<16x32xf32>
    %cst_43 = arith.constant 2.000000e+00 : f32
    %154 = math.sqrt %cst_43 : f32
    %155 = vector.broadcast %154 : f32 to vector<16x32xf32>
    %156 = arith.divf %151, %155 : vector<16x32xf32>
    %157 = math.erf %156 : vector<16x32xf32>
    %cst_44 = arith.constant 1.000000e+00 : f32
    %158 = vector.broadcast %cst_44 : f32 to vector<16x32xf32>
    %159 = arith.addf %158, %157 : vector<16x32xf32>
    %160 = arith.mulf %153, %159 : vector<16x32xf32>
    %c0_45 = arith.constant 0 : index
    %c0_46 = arith.constant 0 : index
    %161 = vector.load %arg4[%c0_45, %c0_46] : memref<16x32xf32, #tpu.memory_space<vmem>>, vector<16x32xf32>
    tpu.vector_store %arg4[%c0_45, %c0_46], %160 {strides = array<i32>} : memref<16x32xf32, #tpu.memory_space<vmem>>, vector<16x32xf32>,
    return
  }
  func.func @transform_0(%arg0: i32) -> (i32, i32, i32) {
    %c0_i32 = arith.constant 0 : i32
    %c0_i32_0 = arith.constant 0 : i32
    %c0_i32_1 = arith.constant 0 : i32
    %c0_i32_2 = arith.constant 0 : i32
    return %c0_i32, %c0_i32_0, %c0_i32_1 : i32, i32, i32
  }
  func.func @transform_1(%arg0: i32) -> (i32, i32, i32) {
    %c0_i32 = arith.constant 0 : i32
    %c0_i32_0 = arith.constant 0 : i32
    %c0_i32_1 = arith.constant 0 : i32
    %c0_i32_2 = arith.constant 0 : i32
    return %c0_i32, %c0_i32_0, %c0_i32_1 : i32, i32, i32
  }
  func.func @transform_2(%arg0: i32) -> (i32, i32, i32) {
    %c0_i32 = arith.constant 0 : i32
    %c0_i32_0 = arith.constant 0 : i32
    %c0_i32_1 = arith.constant 0 : i32
    %c0_i32_2 = arith.constant 0 : i32
    return %c0_i32, %c0_i32_0, %c0_i32_1 : i32, i32, i32
  }
  func.func @transform_3(%arg0: i32) -> (i32, i32) {
    %c0_i32 = arith.constant 0 : i32
    %c0_i32_0 = arith.constant 0 : i32
    %c0_i32_1 = arith.constant 0 : i32
    return %c0_i32, %c0_i32_0 : i32, i32
  }
}

</mosaic_0001>

<bundles_post_ra>
// kernel: tpu_custom_call.1
= control target key start
LH: loop header
LB: loop body
LE: loop exit
PB: predicated region body
PF: predicated region fallthrough
CT: control target
= control target key end

     0   :  { %8 = vsyncpa [#allocation3], 0  ;;  %s4214_s0 = inlined_call_operand.hbm [shape: f32[3,16,32], index: 0, kind: input, shape index: {}]   ;;  %s4215_s1 = inlined_call_operand.hbm [shape: f32[4,32,32], index: 1, kind: input, shape index: {}]   ;;  %s4216_s2 = inlined_call_operand.vmem [shape: f32[4,1,32], index: 2, kind: input, shape index: {}]   ;;  %s4217_s3 = inlined_call_operand.hbm [shape: f32[16,32], index: 3, kind: output, shape index: {}]  }
   0x1   :  { %9 = vsyncpa [#allocation6], 0 }
   0x2   :  { %10 = vsyncpa [#allocation4], 0  ;;  %s3729_s12 = smov [#allocation2]   ;;  %s3657_s16 = scalar_lea.hbm %s4214_s0, 768 }
   0x3   :  { %s16_s13 = sshll.u32 %s3729_s12, 4  ;;  %p3658_p0 = scmp.ne.s32.totalorder %s4214_s0, %s3657_s16  ;;  %s17_s13 = int_to_ptr.vmem [resolvable:$true] %s16_s13 }
   0x4   :  { %p3661_p1 = scmp.lt.u32.totalorder %s3657_s16, %s4214_s0 }
   0x6   :  { %p3663_p2 = pnand %p3661_p1, %p3658_p0 }
   0x8   :  { %3666 = shalt.err (!%p3663_p2)
}
   0x9   :  { %s3667_s21 = scalar_lea.vmem %s17_s13, 768  ;;  %p3672_p4 = scmp.lt.s32.totalorder %s17_s13, %s17_s13 }
   0xa   :  { %p3668_p3 = scmp.ne.s32.totalorder %s17_s13, %s3667_s21  ;;  %p3673_p5 = scmp.lt.s32.totalorder %s3667_s21, %s3667_s21 }
   0xc   :  { %p3674_p6 = por %p3673_p5, %p3672_p4 }
   0xe   :  { %p3675_p7 = pnand %p3674_p6, %p3668_p3 }
  0x10   :  { %3678 = shalt.err (!%p3675_p7)
}
  0x11   :  { %s3730_s22 = smov 128   ;;  %s3731_s23 = smov 8  }
  0x12   :  { %22 = dma.hbm_to_vmem [thread:$0]  %s4214_s0, 768, %s17_s13, [#allocation3], %s3730_s22, %s3730_s22, %s3731_s23  }
  0x13   :  { %s3732_s26 = smov [#allocation5]   ;;  %s3679_s30 = scalar_lea.hbm %s4215_s1, 2048 }
  0x14   :  { %s28_s27 = sshll.u32 %s3732_s26, 4  ;;  %p3680_p8 = scmp.ne.s32.totalorder %s4215_s1, %s3679_s30  ;;  %s29_s27 = int_to_ptr.vmem [resolvable:$true] %s28_s27 }
  0x15   :  { %p3683_p9 = scmp.lt.u32.totalorder %s3679_s30, %s4215_s1 }
  0x17   :  { %p3685_p10 = pnand %p3683_p9, %p3680_p8 }
  0x19   :  { %3688 = shalt.err (!%p3685_p10)
}
  0x1a   :  { %s3689_s8 = scalar_lea.vmem %s29_s27, 2048  ;;  %p3694_p12 = scmp.lt.s32.totalorder %s29_s27, %s29_s27 }
  0x1b   :  { %p3690_p11 = scmp.ne.s32.totalorder %s29_s27, %s3689_s8  ;;  %p3695_p13 = scmp.lt.s32.totalorder %s3689_s8, %s3689_s8 }
  0x1d   :  { %p3696_p0 = por %p3695_p13, %p3694_p12 }
  0x1f   :  { %p3697_p1 = pnand %p3696_p0, %p3690_p11 }
  0x21   :  { %3700 = shalt.err (!%p3697_p1)
}
  0x22   :  { %34 = dma.hbm_to_vmem [thread:$0]  %s4215_s1, 2048, %s29_s27, [#allocation6], %s3730_s22, %s3730_s22, %s3731_s23  }
  0x23   :  { %3723 = dma.done.wait [#allocation3], 768  }
  0x24   :  { %3724 = vsyncadd [#allocation3], 4294966528 }
  0x25   :  { %3725 = dma.done.wait [#allocation6], 2048  }
  0x26   :  { %3726 = vsyncadd [#allocation6], 4294965248  ;;  %v142_v0 = vld [vmem:[#allocation5 + $0x20] sm:$0xff]  ;;  %v143_v1 = vld [vmem:[#allocation5 + $0x28] sm:$0xff]  ;;  %vm56_vm0 = vcmask 261120   ;;  %v3733_v24 = vmov 0.0  }
  0x27   :  { %v45_v2 = vld [vmem:[#allocation5] sm:$0xff]  ;;  %v3545_v3 = vpack.c.bf16 %v143_v1, %v142_v0  ;;  %v46_v4 = vld [vmem:[#allocation5 + $0x8] sm:$0xff]  ;;  %v144_v5 = vld [vmem:[#allocation5 + $0x30] sm:$0xff]  ;;  %vm3734_vm1 = vmmov 0   ;;  %vm436_vm2 = vcmask 31744   ;;  %s3735_s13 = smov 120  }
  0x28   :  { %v145_v6 = vld [vmem:[#allocation5 + $0x38] sm:$0xff]  ;;  %v3537_v7 = vpack.c.bf16 %v46_v4, %v45_v2  ;;  %v47_v9 = vld [vmem:[#allocation5 + $0x10] sm:$0xff]  ;;  %v139_v11 = vld [vmem:[#allocation2 + $0x10] sm:$0xff]  ;;  %s3736_s14 = smov 124   ;;  %s3737_s15 = smov 116   ;;  %vm1029_vm3 = vcmask 64512  }
  0x29   :  { %v3549_v8 = vpack.c.bf16 %v145_v6, %v144_v5  ;;  %v48_v10 = vld [vmem:[#allocation5 + $0x18] sm:$0xff]  ;;  %3546 = vmatprep.subr.bf16.mxu1 %v3545_v3  ;;  %3352 = vmatprep.mubr.msk.f32.mxu1 %vm56_vm0, %v139_v11  ;;  %v43_v13 = vld [vmem:[#allocation2] sm:$0xff]  ;;  %v239_v14 = vld [vmem:[#allocation5 + $0x40] sm:$0xff]  ;;  %s3738_s16 = smov 108   ;;  %s3739_s17 = smov 112   ;;  %vm1740_vm4 = vcmask 97280  }
  0x2a   :  { %v3541_v12 = vpack.c.bf16 %v48_v10, %v47_v9  ;;  %3548 = vmatpush3.bf16.msra.mxu1 %v3545_v3  ;;  %3538 = vmatprep.subr.bf16.mxu0 %v3537_v7  ;;  %v240_v15 = vld [vmem:[#allocation5 + $0x48] sm:$0xff]  ;;  %v241_v17 = vld [vmem:[#allocation5 + $0x50] sm:$0xff]  ;;  %v242_v18 = vld [vmem:[#allocation5 + $0x58] sm:$0xff]  ;;  %s3740_s20 = smov 100   ;;  %s3741_s21 = smov 104   ;;  %vm1742_vm5 = vcmask 130048  }
  0x2b   :  { %3540 = vmatpush3.bf16.msra.mxu0 %v3537_v7  ;;  %3550 = vmatprep.subr.bf16.mxu1 %v3549_v8  ;;  %v3553_v16 = vpack.c.bf16 %v240_v15, %v239_v14  ;;  %v140_v19 = vld [vmem:[#allocation2 + $0x18] sm:$0xff]  ;;  %v44_v20 = vld [vmem:[#allocation2 + $0x8] sm:$0xff]  ;;  %v3557_v21 = vpack.c.bf16 %v242_v18, %v241_v17  ;;  %v236_v22 = vld [vmem:[#allocation2 + $0x20] sm:$0xff]  ;;  %s3742_s24 = smov 4   ;;  %s3743_s25 = smov 12   ;;  %vm1744_vm6 = vcmask 162816  }
  0x2c   :  { %3542 = vmatprep.subr.bf16.mxu0 %v3541_v12  ;;  %3341 = vmatprep.mubr.msk.f32.mxu0 %vm56_vm0, %v43_v13  ;;  %v237_v23 = vld [vmem:[#allocation2 + $0x28] sm:$0xff]  ;;  %v3186_v25 = vld [vmem:[%s4216_s2 + $0x1] ss:$0 sm:$0xff]  ;;  %v3182_v29 = vld [vmem:[%s4216_s2] ss:$0 sm:$0xff]  ;;  %s3744_s26 = smov 16  }
  0x2d   :  { %v3190_v34 = vld [vmem:[%s4216_s2 + $0x2] ss:$0 sm:$0xff]  ;;  %s3745_s27 = smov 20   ;;  %s3746_s28 = smov 24   ;;  %vm1746_vm7 = vcmask 195584   ;;  %vm1748_vm8 = vcmask 228352  }
  0x2e   :  { %3552 = vmatpush3.bf16.msra.mxu1 %v3549_v8  ;;  %s3747_s29 = smov 28   ;;  %s3748_s5 = smov [#allocation7]  }
  0x2f   :  { %3544 = vmatpush3.bf16.msra.mxu0 %v3541_v12  ;;  %3366 = vmatprep.subr.mxu1 %v3733_v24  ;;  %s3169_s6 = sshll.u32 %s3748_s5, 4  ;;  %s3170_s6 = int_to_ptr.vmem [resolvable:$true] %s3169_s6 }
  0x30   :  { %3554 = vmatprep.subr.bf16.mxu0 %v3553_v16  ;;  %p3706_p3 = scmp.lt.s32.totalorder %s3170_s6, %s3170_s6 }
  0x31   :  { %3353 = vmatmul.mubr.msk.f32.vlgmr.msra.gmra.mrb[0].mxu1 %vm56_vm0, %v140_v19 }
  0x32   :  { %3342 = vmatmul.mubr.msk.f32.vlgmr.msra.gmra.mrb[0].mxu0 %vm56_vm0, %v44_v20  ;;  %3368 = vmatprep.mubr.msk.f32.mxu1 %vm3734_vm1, %v3733_v24 }
  0x33   :  { %3556 = vmatpush3.bf16.msra.mxu0 %v3553_v16  ;;  %3363 = vmatprep.mubr.msk.f32.mxu0 %vm56_vm0, %v236_v22 }
  0x34   :  { %3558 = vmatprep.subr.bf16.mxu0 %v3557_v21 }
  0x37   :  { %3560 = vmatpush3.bf16.msra.mxu0 %v3557_v21 }
  0x38   :  { %3386 = vmatprep.subr.mxu0 %v3733_v24 }
  0x3a   :  { %3364 = vmatmul.mubr.msk.f32.vlgmr.msra.gmra.mrb[2].mxu0 %vm56_vm0, %v237_v23 }
  0x3b   :  { %3388 = vmatprep.mubr.msk.f32.mxu0 %vm3734_vm1, %v3733_v24 }
 0x104   :  { %v3354_v26 = vpop.f32.mrb[0].mxu1 }
 0x105   :  { %v226_v27 = vpop.f32.mrb[1].mxu1  ;;  %v3343_v28 = vpop.f32.mrb[0].mxu0  ;;  %v3841_v37 = vadd.f32 %v3354_v26, %v3186_v25 }
 0x106   :  { %v227_v30 = vadd.f32 %v3186_v25, %v226_v27  ;;  %v129_v31 = vpop.f32.mrb[1].mxu0  ;;  %v3843_v38 = vadd.f32 %v3343_v28, %v3182_v29 }
 0x107   :  { %v130_v32 = vadd.f32 %v3182_v29, %v129_v31 }
 0x108   :  { %368 = vrot.lane.b32.xlu1 %v227_v30, %s3735_s13  ;;  %364 = vrot.lane.b32.xlu0 %v227_v30, %s3736_s14 }
 0x109   :  { %3367 = vmatpush3.xpose.msk.msra.mxu1 %vm436_vm2, %v227_v30 }
 0x10a   :  { %3371 = vmatprep.subr.mxu1 %v3733_v24 }
 0x10c   :  { %3369 = vmatmul.mubr.msk.f32.vlgmr.msra.gmra.mrb[2].mxu1 %vm436_vm2, %v130_v32  ;;  %338 = vrot.lane.b32.xlu1 %v130_v32, %s3735_s13 }
 0x10d   :  { %334 = vrot.lane.b32.xlu0 %v130_v32, %s3736_s14  ;;  %3373 = vmatprep.mubr.msk.f32.mxu1 %vm3734_vm1, %v3733_v24  ;;  %v3365_v33 = vpop.f32.mrb[2].mxu0 }
 0x10e   :  { %v3836_v35 = vadd.f32 %v3365_v33, %v3190_v34  ;;  %v323_v36 = vpop.f32.mrb[3].mxu0 }
 0x10f   :  { %v324_v39 = vadd.f32 %v3190_v34, %v323_v36 }
 0x110   :  { %342 = vrot.lane.b32.xlu1 %v130_v32, %s3737_s15 }
 0x111   :  { %372 = vrot.lane.b32.xlu0 %v227_v30, %s3737_s15 }
 0x114   :  { %380 = vrot.lane.b32.xlu1 %v227_v30, %s3738_s16 }
 0x115   :  { %376 = vrot.lane.b32.xlu0 %v227_v30, %s3739_s17 }
 0x118   :  { %350 = vrot.lane.b32.xlu1 %v130_v32, %s3738_s16 }
 0x119   :  { %346 = vrot.lane.b32.xlu0 %v130_v32, %s3739_s17 }
 0x11c   :  { %388 = vrot.lane.b32.xlu1 %v227_v30, %s3740_s20 }
 0x11d   :  { %384 = vrot.lane.b32.xlu0 %v227_v30, %s3741_s21 }
 0x120   :  { %358 = vrot.lane.b32.xlu1 %v130_v32, %s3740_s20 }
 0x121   :  { %354 = vrot.lane.b32.xlu0 %v130_v32, %s3741_s21 }
 0x124   :  { %366 = vrot.lane.b32.xlu1 %v3841_v37, %s3736_s14 }
 0x125   :  { %336 = vrot.lane.b32.xlu0 %v3843_v38, %s3736_s14 }
 0x128   :  { %370 = vrot.lane.b32.xlu1 %v3841_v37, %s3735_s13 }
 0x129   :  { %374 = vrot.lane.b32.xlu0 %v3841_v37, %s3737_s15 }
 0x12c   :  { %394 = vrot.lane.b32.xlu1 %v324_v39, %s3736_s14 }
 0x12d   :  { %400 = vrot.lane.b32.xlu0 %v324_v39, %s3735_s13 }
 0x130   :  { %406 = vrot.lane.b32.xlu1 %v324_v39, %s3737_s15 }
 0x131   :  { %418 = vrot.lane.b32.xlu0 %v324_v39, %s3738_s16 }
 0x134   :  { %412 = vrot.lane.b32.xlu1 %v324_v39, %s3739_s17 }
 0x135   :  { %430 = vrot.lane.b32.xlu0 %v324_v39, %s3740_s20 }
 0x138   :  { %424 = vrot.lane.b32.xlu1 %v324_v39, %s3741_s21 }
 0x17a   :  { %v369_v40 = vpop.permute.xlu1 %368  ;;  %v365_v41 = vpop.permute.xlu0 %364 }
 0x17b   :  { %3372 = vmatpush3.xpose.msk.msra.mxu1 %vm436_vm2, %v365_v41 }
 0x17c   :  { %3376 = vmatprep.subr.mxu1 %v3733_v24 }
 0x17e   :  { %v339_v42 = vpop.permute.xlu1 %338 }
 0x17f   :  { %v335_v43 = vpop.permute.xlu0 %334 }
 0x180   :  { %3374 = vmatmul.mubr.msk.f32.vlgmr.msra.gmra.mrb[4].mxu1 %vm436_vm2, %v335_v43 }
 0x181   :  { %3377 = vmatpush3.xpose.msk.msra.mxu1 %vm436_vm2, %v369_v40  ;;  %3378 = vmatprep.mubr.msk.f32.mxu1 %vm3734_vm1, %v3733_v24 }
 0x182   :  { %v343_v44 = vpop.permute.xlu1 %342  ;;  %3381 = vmatprep.subr.mxu1 %v3733_v24 }
 0x183   :  { %v373_v45 = vpop.permute.xlu0 %372 }
 0x184   :  { %3379 = vmatmul.mubr.msk.f32.vlgmr.msra.gmra.mrb[6].mxu1 %vm436_vm2, %v339_v42 }
 0x185   :  { %3382 = vmatpush3.xpose.msk.msra.mxu1 %vm436_vm2, %v373_v45  ;;  %3383 = vmatprep.mubr.msk.f32.mxu1 %vm3734_vm1, %v3733_v24 }
 0x186   :  { %v381_v46 = vpop.permute.xlu1 %380  ;;  %3391 = vmatprep.subr.mxu1 %v3733_v24 }
 0x187   :  { %v377_v47 = vpop.permute.xlu0 %376 }
 0x188   :  { %3384 = vmatmul.mubr.msk.f32.vlgmr.msra.gmra.mrb[8].mxu1 %vm436_vm2, %v343_v44  ;;  %3387 = vmatpush3.xpose.msk.msra.mxu0 %vm436_vm2, %v377_v47 }
 0x189   :  { %3392 = vmatpush3.xpose.msk.msra.mxu1 %vm436_vm2, %v381_v46  ;;  %3393 = vmatprep.mubr.msk.f32.mxu1 %vm3734_vm1, %v3733_v24 }
 0x18a   :  { %v351_v48 = vpop.permute.xlu1 %350  ;;  %3396 = vmatprep.subr.mxu0 %v3733_v24  ;;  %3401 = vmatprep.subr.mxu1 %v3733_v24 }
 0x18b   :  { %v347_v49 = vpop.permute.xlu0 %346 }
 0x18c   :  { %3389 = vmatmul.mubr.msk.f32.vlgmr.msra.gmra.mrb[4].mxu0 %vm436_vm2, %v347_v49  ;;  %3394 = vmatmul.mubr.msk.f32.vlgmr.msra.gmra.mrb[10].mxu1 %vm436_vm2, %v351_v48 }
 0x18d   :  { %3398 = vmatprep.mubr.msk.f32.mxu0 %vm3734_vm1, %v3733_v24  ;;  %3403 = vmatprep.mubr.msk.f32.mxu1 %vm3734_vm1, %v3733_v24 }
 0x18e   :  { %v389_v50 = vpop.permute.xlu1 %388 }
 0x18f   :  { %v385_v51 = vpop.permute.xlu0 %384  ;;  %3402 = vmatpush3.xpose.msk.msra.mxu1 %vm436_vm2, %v389_v50 }
 0x190   :  { %3397 = vmatpush3.xpose.msk.msra.mxu0 %vm436_vm2, %v385_v51  ;;  %3411 = vmatprep.subr.mxu1 %v3733_v24 }
 0x191   :  { %3406 = vmatprep.subr.mxu0 %v3733_v24 }
 0x192   :  { %v359_v52 = vpop.permute.xlu1 %358 }
 0x193   :  { %v355_v53 = vpop.permute.xlu0 %354  ;;  %3404 = vmatmul.mubr.msk.f32.vlgmr.msra.gmra.mrb[12].mxu1 %vm436_vm2, %v359_v52 }
 0x194   :  { %3399 = vmatmul.mubr.msk.f32.vlgmr.msra.gmra.mrb[6].mxu0 %vm436_vm2, %v355_v53  ;;  %3413 = vmatprep.mubr.msk.f32.mxu1 %vm3734_vm1, %v3733_v24 }
 0x195   :  { %3407 = vmatpush3.msra.mxu0 %v324_v39  ;;  %3408 = vmatprep.mubr.msk.f32.mxu0 %vm3734_vm1, %v3733_v24 }
 0x196   :  { %3416 = vmatprep.subr.mxu0 %v3733_v24  ;;  %v3897_v57 = vpop.permute.xlu1 %366 }
 0x197   :  { %v3902_v60 = vpop.permute.xlu0 %336 }
 0x19a   :  { %v3899_v58 = vpop.permute.xlu1 %370 }
 0x19b   :  { %v3905_v1 = vpop.permute.xlu0 %374 }
 0x19e   :  { %v395_v59 = vpop.permute.xlu1 %394 }
 0x19f   :  { %3412 = vmatpush3.msra.mxu1 %v395_v59  ;;  %v401_v7 = vpop.permute.xlu0 %400 }
 0x1a0   :  { %3421 = vmatprep.subr.mxu1 %v3733_v24 }
 0x1a2   :  { %v407_v27 = vpop.permute.xlu1 %406 }
 0x1a3   :  { %v3912_v13 = vpop.permute.xlu0 %418 }
 0x1a6   :  { %v413_v28 = vpop.permute.xlu1 %412 }
 0x1a7   :  { %v3922_v19 = vpop.permute.xlu0 %430 }
 0x1aa   :  { %v3963_v29 = vpop.permute.xlu1 %424 }
 0x1df   :  { %v507_v54 = vpop.f32.mrb[2].mxu1 }
 0x1e0   :  { %v3370_v55 = vpop.f32.mrb[3].mxu1  ;;  %v1030_v56 = vsel %vm1029_vm3, %v507_v54, -inf }
 0x1e1   :  { %1031 = vmax.xlane.f32.xlu0 %v1030_v56 }
 0x253   :  { %v581_v61 = vpop.f32.mrb[4].mxu1 }
 0x254   :  { %v3375_v62 = vpop.f32.mrb[5].mxu1  ;;  %v1033_v63 = vsel %vm1029_vm3, %v581_v61, -inf }
 0x255   :  { %1034 = vmax.xlane.f32.xlu1 %v1033_v63 }
 0x257   :  { %v655_v0 = vpop.f32.mrb[6].mxu1 }
 0x258   :  { %v3380_v2 = vpop.f32.mrb[7].mxu1  ;;  %v1036_v3 = vsel %vm1029_vm3, %v655_v0, -inf }
 0x259   :  { %1037 = vmax.xlane.f32.xlu0 %v1036_v3 }
 0x25b   :  { %v729_v4 = vpop.f32.mrb[8].mxu1 }
 0x25c   :  { %v3385_v5 = vpop.f32.mrb[9].mxu1  ;;  %v1039_v6 = vsel %vm1029_vm3, %v729_v4, -inf }
 0x25d   :  { %1040 = vmax.xlane.f32.xlu0 %v1039_v6 }
 0x25f   :  { %v3909_v8 = vpop.f32.mrb[4].mxu0  ;;  %v877_v9 = vpop.f32.mrb[10].mxu1 }
 0x260   :  { %v3390_v10 = vpop.f32.mrb[5].mxu0  ;;  %v3395_v11 = vpop.f32.mrb[11].mxu1  ;;  %v1045_v12 = vsel %vm1029_vm3, %v877_v9, -inf  ;;  %v1042_v25 = vsel %vm1029_vm3, %v3909_v8, -inf }
 0x261   :  { %1046 = vmax.xlane.f32.xlu0 %v1045_v12 }
 0x266   :  { %340 = vrot.lane.b32.xlu1 %v3843_v38, %s3735_s13  ;;  %v3916_v14 = vpop.f32.mrb[12].mxu1 }
 0x267   :  { %v3918_v15 = vpop.f32.mrb[6].mxu0  ;;  %v3405_v16 = vpop.f32.mrb[13].mxu1  ;;  %v1051_v17 = vsel %vm1029_vm3, %v3916_v14, -inf }
 0x268   :  { %v3400_v18 = vpop.f32.mrb[7].mxu0  ;;  %1052 = vmax.xlane.f32.xlu0 %v1051_v17  ;;  %v1048_v26 = vsel %vm1029_vm3, %v3918_v15, -inf }
 0x26e   :  { %v1032_v20 = vpop.xlane.xlu0 %1031 }
 0x26f   :  { %v1054_v21 = vsub.f32 %v507_v54, %v1032_v20 }
 0x271   :  { %v1062_v22 = vmul.f32 1.442695, %v1054_v21 }
 0x273   :  { %3589 = vpow2.f32 %v1062_v22 }
 0x27d   :  { %v3924_v23 = vpop.eup %3589 }
 0x27e   :  { %3409 = vmatmul.mubr.msk.f32.vlgmr.msra.gmra.mrb[8].mxu0 %vm1029_vm3, %v3924_v23  ;;  %344 = vrot.lane.b32.xlu0 %v3843_v38, %s3737_s15 }
 0x27f   :  { %3417 = vmatpush3.msra.mxu0 %v401_v7  ;;  %3418 = vmatprep.mubr.msk.f32.mxu0 %vm3734_vm1, %v3733_v24 }
 0x280   :  { %3426 = vmatprep.subr.mxu0 %v3733_v24 }
 0x282   :  { %382 = vrot.lane.b32.xlu0 %v3841_v37, %s3738_s16 }
 0x286   :  { %352 = vrot.lane.b32.xlu0 %v3843_v38, %s3738_s16 }
 0x28a   :  { %1043 = vmax.xlane.f32.xlu1 %v1042_v25  ;;  %390 = vrot.lane.b32.xlu0 %v3841_v37, %s3740_s20 }
 0x28e   :  { %1049 = vmax.xlane.f32.xlu1 %v1048_v26  ;;  %360 = vrot.lane.b32.xlu0 %v3843_v38, %s3740_s20 }
 0x292   :  { %396 = vrot.lane.b32.xlu0 %v3836_v35, %s3736_s14 }
 0x296   :  { %414 = vrot.lane.b32.xlu0 %v3836_v35, %s3739_s17 }
 0x29f   :  { %378 = vrot.lane.b32.xlu1 %v3841_v37, %s3739_s17 }
 0x2a3   :  { %348 = vrot.lane.b32.xlu1 %v3843_v38, %s3739_s17 }
 0x2a7   :  { %386 = vrot.lane.b32.xlu1 %v3841_v37, %s3741_s21 }
 0x2ab   :  { %356 = vrot.lane.b32.xlu1 %v3843_v38, %s3741_s21 }
 0x2af   :  { %402 = vrot.lane.b32.xlu1 %v3836_v35, %s3735_s13 }
 0x2b3   :  { %408 = vrot.lane.b32.xlu1 %v3836_v35, %s3737_s15 }
 0x2b7   :  { %420 = vrot.lane.b32.xlu1 %v3836_v35, %s3738_s16 }
 0x2e2   :  { %v1035_v30 = vpop.xlane.xlu1 %1034 }
 0x2e3   :  { %v1055_v31 = vsub.f32 %v581_v61, %v1035_v30 }
 0x2e5   :  { %v1064_v32 = vmul.f32 1.442695, %v1055_v31 }
 0x2e6   :  { %v1038_v33 = vpop.xlane.xlu0 %1037  ;;  %v341_v59 = vpop.permute.xlu1 %340 }
 0x2e7   :  { %3591 = vpow2.f32 %v1064_v32  ;;  %v1056_v34 = vsub.f32 %v655_v0, %v1038_v33 }
 0x2e9   :  { %v1066_v36 = vmul.f32 1.442695, %v1056_v34 }
 0x2ea   :  { %v1041_v39 = vpop.xlane.xlu0 %1040 }
 0x2eb   :  { %3593 = vpow2.f32 %v1066_v36  ;;  %v1057_v40 = vsub.f32 %v729_v4, %v1041_v39 }
 0x2ed   :  { %v1068_v41 = vmul.f32 1.442695, %v1057_v40 }
 0x2ee   :  { %v1047_v42 = vpop.xlane.xlu0 %1046 }
 0x2ef   :  { %3595 = vpow2.f32 %v1068_v41  ;;  %v1059_v43 = vsub.f32 %v877_v9, %v1047_v42 }
 0x2f1   :  { %v3965_v44 = vpop.eup %3591  ;;  %v1072_v45 = vmul.f32 1.442695, %v1059_v43 }
 0x2f2   :  { %3414 = vmatmul.mubr.msk.f32.vlgmr.msra.gmra.mrb[14].mxu1 %vm1029_vm3, %v3965_v44 }
 0x2f3   :  { %3597 = vpow2.f32 %v1072_v45  ;;  %3422 = vmatpush3.msra.mxu1 %v407_v27  ;;  %3423 = vmatprep.mubr.msk.f32.mxu1 %vm3734_vm1, %v3733_v24 }
 0x2f4   :  { %3431 = vmatprep.subr.mxu1 %v3733_v24 }
 0x2f5   :  { %v3972_v46 = vpop.eup %3593  ;;  %v1053_v47 = vpop.xlane.xlu0 %1052 }
 0x2f6   :  { %3419 = vmatmul.mubr.msk.f32.vlgmr.msra.gmra.mrb[10].mxu0 %vm1029_vm3, %v3972_v46  ;;  %v1061_v48 = vsub.f32 %v3916_v14, %v1053_v47 }
 0x2f7   :  { %3427 = vmatpush3.msra.mxu0 %v413_v28  ;;  %3428 = vmatprep.mubr.msk.f32.mxu0 %vm3734_vm1, %v3733_v24 }
 0x2f8   :  { %v1076_v49 = vmul.f32 1.442695, %v1061_v48  ;;  %3436 = vmatprep.subr.mxu0 %v3733_v24 }
 0x2f9   :  { %v3980_v50 = vpop.eup %3595  ;;  %v345_v51 = vpop.permute.xlu0 %344 }
 0x2fa   :  { %3599 = vpow2.f32 %v1076_v49  ;;  %3424 = vmatmul.mubr.msk.f32.vlgmr.msra.gmra.mrb[16].mxu1 %vm1029_vm3, %v3980_v50 }
 0x2fb   :  { %3432 = vmatpush3.msra.mxu1 %v3912_v13  ;;  %3433 = vmatprep.mubr.msk.f32.mxu1 %vm3734_vm1, %v3733_v24 }
 0x2fc   :  { %3441 = vmatprep.subr.mxu1 %v3733_v24 }
 0x2fd   :  { %v3988_v52 = vpop.eup %3597  ;;  %v383_v53 = vpop.permute.xlu0 %382 }
 0x2fe   :  { %3434 = vmatmul.mubr.msk.f32.vlgmr.msra.gmra.mrb[18].mxu1 %vm1029_vm3, %v3988_v52 }
 0x2ff   :  { %3442 = vmatpush3.msra.mxu1 %v3922_v19  ;;  %3443 = vmatprep.mubr.msk.f32.mxu1 %vm3734_vm1, %v3733_v24 }
 0x300   :  { %3451 = vmatprep.subr.mxu1 %v3733_v24 }
 0x301   :  { %v353_v54 = vpop.permute.xlu0 %352 }
 0x304   :  { %v3996_v55 = vpop.eup %3599 }
 0x305   :  { %3444 = vmatmul.mubr.msk.f32.vlgmr.msra.gmra.mrb[20].mxu1 %vm1029_vm3, %v3996_v55  ;;  %v391_v56 = vpop.permute.xlu0 %390 }
 0x306   :  { %3452 = vmatpush3.xpose.msk.msra.mxu1 %vm436_vm2, %v3897_v57  ;;  %3453 = vmatprep.mubr.msk.f32.mxu1 %vm3734_vm1, %v3733_v24 }
 0x307   :  { %3461 = vmatprep.subr.mxu1 %v3733_v24 }
 0x309   :  { %3454 = vmatmul.mubr.msk.f32.vlgmr.msra.gmra.mrb[22].mxu1 %vm436_vm2, %v3902_v60  ;;  %v361_v57 = vpop.permute.xlu0 %360 }
 0x30a   :  { %3462 = vmatpush3.xpose.msk.msra.mxu1 %vm436_vm2, %v3905_v1  ;;  %3463 = vmatprep.mubr.msk.f32.mxu1 %vm3734_vm1, %v3733_v24 }
 0x30b   :  { %3471 = vmatprep.subr.mxu1 %v3733_v24 }
 0x30d   :  { %3464 = vmatmul.mubr.msk.f32.vlgmr.msra.gmra.mrb[24].mxu1 %vm436_vm2, %v345_v51  ;;  %v397_v60 = vpop.permute.xlu0 %396 }
 0x30e   :  { %3472 = vmatpush3.xpose.msk.msra.mxu1 %vm436_vm2, %v383_v53  ;;  %3473 = vmatprep.mubr.msk.f32.mxu1 %vm3734_vm1, %v3733_v24 }
 0x30f   :  { %3481 = vmatprep.subr.mxu1 %v3733_v24 }
 0x311   :  { %3474 = vmatmul.mubr.msk.f32.vlgmr.msra.gmra.mrb[26].mxu1 %vm436_vm2, %v353_v54 }
 0x312   :  { %3482 = vmatpush3.xpose.msk.msra.mxu1 %vm436_vm2, %v391_v56  ;;  %3483 = vmatprep.mubr.msk.f32.mxu1 %vm3734_vm1, %v3733_v24  ;;  %v1081_v56 = vsel %vm1029_vm3, %v3965_v44, 0.0  ;;  %v415_v44 = vpop.permute.xlu0 %414 }
 0x313   :  { %3491 = vmatprep.subr.mxu1 %v3733_v24 }
 0x315   :  { %3484 = vmatmul.mubr.msk.f32.vlgmr.msra.gmra.mrb[28].mxu1 %vm436_vm2, %v361_v57  ;;  %v1084_v57 = vsel %vm1029_vm3, %v3972_v46, 0.0 }
 0x316   :  { %3492 = vmatpush3.msra.mxu1 %v397_v60  ;;  %3493 = vmatprep.mubr.msk.f32.mxu1 %vm3734_vm1, %v3733_v24 }
 0x317   :  { %v1044_v61 = vpop.xlane.xlu1 %1043  ;;  %3501 = vmatprep.subr.mxu1 %v3733_v24 }
 0x318   :  { %v1058_v62 = vsub.f32 %v3909_v8, %v1044_v61  ;;  %v1093_v61 = vsel %vm1029_vm3, %v3988_v52, 0.0  ;;  %v1099_v52 = vsel %vm1029_vm3, %v3996_v55, 0.0 }
 0x31a   :  { %v1070_v63 = vmul.f32 1.442695, %v1058_v62 }
 0x31b   :  { %v1050_v0 = vpop.xlane.xlu1 %1049 }
 0x31c   :  { %3601 = vpow2.f32 %v1070_v63  ;;  %v1060_v1 = vsub.f32 %v3918_v15, %v1050_v0 }
 0x31e   :  { %v1074_v2 = vmul.f32 1.442695, %v1060_v1 }
 0x31f   :  { %v379_v5 = vpop.permute.xlu1 %378 }
 0x320   :  { %3603 = vpow2.f32 %v1074_v2 }
 0x323   :  { %v349_v6 = vpop.permute.xlu1 %348 }
 0x326   :  { %v4028_v3 = vpop.eup %3601 }
 0x327   :  { %3429 = vmatmul.mubr.msk.f32.vlgmr.msra.gmra.mrb[12].mxu0 %vm1029_vm3, %v4028_v3  ;;  %v387_v7 = vpop.permute.xlu1 %386  ;;  %v1090_v60 = vsel %vm1029_vm3, %v4028_v3, 0.0 }
 0x328   :  { %3437 = vmatpush3.msra.mxu0 %v3963_v29  ;;  %3438 = vmatprep.mubr.msk.f32.mxu0 %vm3734_vm1, %v3733_v24 }
 0x329   :  { %3446 = vmatprep.subr.mxu0 %v3733_v24 }
 0x32a   :  { %v4036_v4 = vpop.eup %3603 }
 0x32b   :  { %3439 = vmatmul.mubr.msk.f32.vlgmr.msra.gmra.mrb[14].mxu0 %vm1029_vm3, %v4036_v4 }
 0x32c   :  { %3448 = vmatprep.mubr.msk.f32.mxu0 %vm3734_vm1, %v3733_v24 }
 0x32f   :  { %3447 = vmatpush3.xpose.msk.msra.mxu0 %vm436_vm2, %v3841_v37  ;;  %v357_v37 = vpop.permute.xlu1 %356 }
 0x330   :  { %3456 = vmatprep.subr.mxu0 %v3733_v24 }
 0x332   :  { %3449 = vmatmul.mubr.msk.f32.vlgmr.msra.gmra.mrb[16].mxu0 %vm436_vm2, %v3843_v38 }
 0x333   :  { %3457 = vmatpush3.xpose.msk.msra.mxu0 %vm436_vm2, %v3899_v58  ;;  %3458 = vmatprep.mubr.msk.f32.mxu0 %vm3734_vm1, %v3733_v24  ;;  %v403_v0 = vpop.permute.xlu1 %402 }
 0x334   :  { %3466 = vmatprep.subr.mxu0 %v3733_v24 }
 0x336   :  { %3459 = vmatmul.mubr.msk.f32.vlgmr.msra.gmra.mrb[18].mxu0 %vm436_vm2, %v341_v59  ;;  %v1087_v59 = vsel %vm1029_vm3, %v3980_v50, 0.0 }
 0x337   :  { %3467 = vmatpush3.xpose.msk.msra.mxu0 %vm436_vm2, %v379_v5  ;;  %3468 = vmatprep.mubr.msk.f32.mxu0 %vm3734_vm1, %v3733_v24  ;;  %v409_v1 = vpop.permute.xlu1 %408 }
 0x338   :  { %3476 = vmatprep.subr.mxu0 %v3733_v24 }
 0x33a   :  { %3469 = vmatmul.mubr.msk.f32.vlgmr.msra.gmra.mrb[20].mxu0 %vm436_vm2, %v349_v6 }
 0x33b   :  { %3477 = vmatpush3.xpose.msk.msra.mxu0 %vm436_vm2, %v387_v7  ;;  %3478 = vmatprep.mubr.msk.f32.mxu0 %vm3734_vm1, %v3733_v24  ;;  %v421_v3 = vpop.permute.xlu1 %420 }
 0x33c   :  { %3486 = vmatprep.subr.mxu0 %v3733_v24 }
 0x33e   :  { %3479 = vmatmul.mubr.msk.f32.vlgmr.msra.gmra.mrb[22].mxu0 %vm436_vm2, %v357_v37 }
 0x33f   :  { %3487 = vmatpush3.msra.mxu0 %v3836_v35  ;;  %3488 = vmatprep.mubr.msk.f32.mxu0 %vm3734_vm1, %v3733_v24 }
 0x340   :  { %3496 = vmatprep.subr.mxu0 %v3733_v24 }
 0x351   :  { %v4067_v38 = vpop.f32.mrb[8].mxu0 }
 0x352   :  { %v3410_v58 = vpop.f32.mrb[9].mxu0 }
 0x3c5   :  { %v4069_v8 = vpop.f32.mrb[14].mxu1 }
 0x3c6   :  { %v3415_v9 = vpop.f32.mrb[15].mxu1 }
 0x3c9   :  { %v4071_v10 = vpop.f32.mrb[10].mxu0 }
 0x3ca   :  { %v3420_v11 = vpop.f32.mrb[11].mxu0 }
 0x3cd   :  { %v4073_v12 = vpop.f32.mrb[16].mxu1 }
 0x3ce   :  { %v3425_v13 = vpop.f32.mrb[17].mxu1 }
 0x3d1   :  { %v4075_v14 = vpop.f32.mrb[18].mxu1 }
 0x3d2   :  { %v3435_v15 = vpop.f32.mrb[19].mxu1 }
 0x3d8   :  { %v4077_v16 = vpop.f32.mrb[20].mxu1 }
 0x3d9   :  { %v3445_v17 = vpop.f32.mrb[21].mxu1 }
 0x3dc   :  { %v1894_v18 = vpop.f32.mrb[22].mxu1 }
 0x3dd   :  { %v3455_v19 = vpop.f32.mrb[23].mxu1  ;;  %v2345_v20 = vsel %vm1029_vm3, %v1894_v18, -inf }
 0x3de   :  { %2346 = vmax.xlane.f32.xlu0 %v2345_v20 }
 0x3e0   :  { %v4080_v21 = vpop.f32.mrb[24].mxu1 }
 0x3e1   :  { %v3465_v22 = vpop.f32.mrb[25].mxu1  ;;  %v2351_v42 = vsel %vm1029_vm3, %v4080_v21, -inf }
 0x3e4   :  { %v4082_v25 = vpop.f32.mrb[26].mxu1 }
 0x3e5   :  { %v3475_v26 = vpop.f32.mrb[27].mxu1  ;;  %v2357_v48 = vsel %vm1029_vm3, %v4082_v25, -inf }
 0x3e8   :  { %v4084_v27 = vpop.f32.mrb[28].mxu1 }
 0x3e9   :  { %v3485_v28 = vpop.f32.mrb[29].mxu1  ;;  %v2363_v54 = vsel %vm1029_vm3, %v4084_v27, -inf }
 0x3fa   :  { %v4086_v29 = vpop.f32.mrb[12].mxu0 }
 0x3fb   :  { %v3430_v30 = vpop.f32.mrb[13].mxu0 }
 0x3fe   :  { %v4088_v31 = vpop.f32.mrb[14].mxu0 }
 0x3ff   :  { %v3440_v32 = vpop.f32.mrb[15].mxu0 }
 0x405   :  { %v1820_v33 = vpop.f32.mrb[16].mxu0 }
 0x406   :  { %v3450_v34 = vpop.f32.mrb[17].mxu0  ;;  %v2342_v36 = vsel %vm1029_vm3, %v1820_v33, -inf }
 0x407   :  { %2343 = vmax.xlane.f32.xlu1 %v2342_v36 }
 0x409   :  { %v1968_v39 = vpop.f32.mrb[18].mxu0 }
 0x40a   :  { %v3460_v40 = vpop.f32.mrb[19].mxu0  ;;  %v2348_v41 = vsel %vm1029_vm3, %v1968_v39, -inf }
 0x40b   :  { %2349 = vmax.xlane.f32.xlu0 %v2348_v41  ;;  %2352 = vmax.xlane.f32.xlu1 %v2351_v42 }
 0x40d   :  { %v2116_v43 = vpop.f32.mrb[20].mxu0 }
 0x40e   :  { %v3470_v45 = vpop.f32.mrb[21].mxu0  ;;  %v2354_v47 = vsel %vm1029_vm3, %v2116_v43, -inf }
 0x40f   :  { %2355 = vmax.xlane.f32.xlu0 %v2354_v47  ;;  %2358 = vmax.xlane.f32.xlu1 %v2357_v48 }
 0x411   :  { %v2264_v49 = vpop.f32.mrb[22].mxu0 }
 0x412   :  { %v3480_v51 = vpop.f32.mrb[23].mxu0  ;;  %v2360_v53 = vsel %vm1029_vm3, %v2264_v49, -inf }
 0x413   :  { %2361 = vmax.xlane.f32.xlu0 %v2360_v53  ;;  %2364 = vmax.xlane.f32.xlu1 %v2363_v54 }
 0x424   :  { %432 = vrot.lane.b32.xlu1 %v3836_v35, %s3740_s20 }
 0x429   :  { %426 = vrot.lane.b32.xlu0 %v3836_v35, %s3741_s21  ;;  %v1096_v35 = vsel %vm1029_vm3, %v4036_v4, 0.0 }
 0x448   :  { %1082 = vadd.xlane.f32.xlu0 %v1081_v56  ;;  %1085 = vadd.xlane.f32.xlu1 %v1084_v57 }
 0x44c   :  { %1088 = vadd.xlane.f32.xlu0 %v1087_v59 }
 0x450   :  { %1091 = vadd.xlane.f32.xlu0 %v1090_v60 }
 0x454   :  { %1094 = vadd.xlane.f32.xlu0 %v1093_v61 }
 0x458   :  { %1097 = vadd.xlane.f32.xlu0 %v1096_v35 }
 0x46b   :  { %v2347_v46 = vpop.xlane.xlu0 %2346 }
 0x46c   :  { %v2367_v62 = vsub.f32 %v1894_v18, %v2347_v46 }
 0x46e   :  { %v2376_v63 = vmul.f32 1.442695, %v2367_v62 }
 0x470   :  { %3605 = vpow2.f32 %v2376_v63 }
 0x47a   :  { %v3606_v50 = vpop.eup %3605 }
 0x47b   :  { %3494 = vmatmul.mubr.msk.f32.vlgmr.msra.gmra.mrb[30].mxu1 %vm1029_vm3, %v3606_v50  ;;  %v2393_v2 = vsel %vm1029_vm3, %v3606_v50, 0.0 }
 0x47c   :  { %3502 = vmatpush3.msra.mxu1 %v409_v1  ;;  %2394 = vadd.xlane.f32.xlu0 %v2393_v2 }
 0x47d   :  { %3503 = vmatprep.mubr.msk.f32.mxu1 %vm3734_vm1, %v3733_v24  ;;  %3511 = vmatprep.subr.mxu1 %v3733_v24 }
 0x480   :  { %1100 = vadd.xlane.f32.xlu0 %v1099_v52 }
 0x494   :  { %v2344_v4 = vpop.xlane.xlu1 %2343 }
 0x495   :  { %v2366_v5 = vsub.f32 %v1820_v33, %v2344_v4 }
 0x497   :  { %v2374_v6 = vmul.f32 1.442695, %v2366_v5 }
 0x498   :  { %v2350_v7 = vpop.xlane.xlu0 %2349  ;;  %v2353_v37 = vpop.xlane.xlu1 %2352 }
 0x499   :  { %3607 = vpow2.f32 %v2374_v6  ;;  %v2368_v58 = vsub.f32 %v1968_v39, %v2350_v7  ;;  %v2369_v9 = vsub.f32 %v4080_v21, %v2353_v37 }
 0x49b   :  { %v2378_v11 = vmul.f32 1.442695, %v2368_v58  ;;  %v2380_v13 = vmul.f32 1.442695, %v2369_v9 }
 0x49c   :  { %v2356_v15 = vpop.xlane.xlu0 %2355  ;;  %v2359_v17 = vpop.xlane.xlu1 %2358 }
 0x49d   :  { %3609 = vpow2.f32 %v2378_v11  ;;  %v2370_v18 = vsub.f32 %v2116_v43, %v2356_v15  ;;  %v2371_v19 = vsub.f32 %v4082_v25, %v2359_v17  ;;  %v3058_v15 = vld [vmem:[#allocation5 + $0x60] sm:$0xff]  ;;  %v3059_v17 = vld [vmem:[#allocation5 + $0x68] sm:$0xff] }
 0x49e   :  { %3611 = vpow2.f32 %v2380_v13 }
 0x49f   :  { %v2382_v55 = vmul.f32 1.442695, %v2370_v18  ;;  %v2384_v20 = vmul.f32 1.442695, %v2371_v19  ;;  %v3561_v18 = vpack.c.bf16 %v3059_v17, %v3058_v15 }
 0x4a0   :  { %v2362_v22 = vpop.xlane.xlu0 %2361  ;;  %v2365_v26 = vpop.xlane.xlu1 %2364 }
 0x4a1   :  { %3613 = vpow2.f32 %v2382_v55  ;;  %v2372_v28 = vsub.f32 %v2264_v49, %v2362_v22  ;;  %v2373_v30 = vsub.f32 %v4084_v27, %v2365_v26 }
 0x4a2   :  { %3615 = vpow2.f32 %v2384_v20 }
 0x4a3   :  { %v3608_v32 = vpop.eup %3607  ;;  %v2386_v21 = vmul.f32 1.442695, %v2372_v28  ;;  %v2388_v33 = vmul.f32 1.442695, %v2373_v30  ;;  %v3060_v28 = vld [vmem:[#allocation5 + $0x70] sm:$0xff]  ;;  %v3061_v30 = vld [vmem:[#allocation5 + $0x78] sm:$0xff] }
 0x4a4   :  { %3489 = vmatmul.mubr.msk.f32.vlgmr.msra.gmra.mrb[24].mxu0 %vm1029_vm3, %v3608_v32  ;;  %v427_v40 = vpop.permute.xlu0 %426  ;;  %v433_v41 = vpop.permute.xlu1 %432  ;;  %v2390_v49 = vsel %vm1029_vm3, %v3608_v32, 0.0 }
 0x4a5   :  { %3617 = vpow2.f32 %v2386_v21  ;;  %3497 = vmatpush3.msra.mxu0 %v403_v0  ;;  %3498 = vmatprep.mubr.msk.f32.mxu0 %vm3734_vm1, %v3733_v24  ;;  %v3565_v21 = vpack.c.bf16 %v3061_v30, %v3060_v28 }
 0x4a6   :  { %3619 = vpow2.f32 %v2388_v33  ;;  %3506 = vmatprep.subr.mxu0 %v3733_v24 }
 0x4a7   :  { %v3610_v25 = vpop.eup %3609 }
 0x4a8   :  { %v3612_v34 = vpop.eup %3611  ;;  %3499 = vmatmul.mubr.msk.f32.vlgmr.msra.gmra.mrb[26].mxu0 %vm1029_vm3, %v3610_v25  ;;  %v2396_v27 = vsel %vm1029_vm3, %v3610_v25, 0.0 }
 0x4a9   :  { %3504 = vmatmul.mubr.msk.f32.vlgmr.msra.gmra.mrb[32].mxu1 %vm1029_vm3, %v3612_v34  ;;  %3507 = vmatpush3.msra.mxu0 %v415_v44  ;;  %v2399_v42 = vsel %vm1029_vm3, %v3612_v34, 0.0 }
 0x4aa   :  { %3512 = vmatpush3.msra.mxu1 %v421_v3  ;;  %2397 = vadd.xlane.f32.xlu1 %v2396_v27 }
 0x4ab   :  { %v3614_v36 = vpop.eup %3613  ;;  %3508 = vmatprep.mubr.msk.f32.mxu0 %vm3734_vm1, %v3733_v24  ;;  %3513 = vmatprep.mubr.msk.f32.mxu1 %vm3734_vm1, %v3733_v24 }
 0x4ac   :  { %v3616_v39 = vpop.eup %3615  ;;  %3516 = vmatprep.subr.mxu0 %v3733_v24  ;;  %3521 = vmatprep.subr.mxu1 %v3733_v24  ;;  %v2402_v48 = vsel %vm1029_vm3, %v3614_v36, 0.0 }
 0x4ad   :  { %3509 = vmatmul.mubr.msk.f32.vlgmr.msra.gmra.mrb[28].mxu0 %vm1029_vm3, %v3614_v36  ;;  %3514 = vmatmul.mubr.msk.f32.vlgmr.msra.gmra.mrb[34].mxu1 %vm1029_vm3, %v3616_v39  ;;  %v2405_v51 = vsel %vm1029_vm3, %v3616_v39, 0.0 }
 0x4ae   :  { %3517 = vmatpush3.msra.mxu0 %v427_v40  ;;  %3522 = vmatpush3.msra.mxu1 %v433_v41 }
 0x4af   :  { %v3618_v43 = vpop.eup %3617  ;;  %2400 = vadd.xlane.f32.xlu1 %v2399_v42  ;;  %3518 = vmatprep.mubr.msk.f32.mxu0 %vm3734_vm1, %v3733_v24 }
 0x4b0   :  { %v3620_v45 = vpop.eup %3619  ;;  %3523 = vmatprep.mubr.msk.f32.mxu1 %vm3734_vm1, %v3733_v24  ;;  %v2408_v53 = vsel %vm1029_vm3, %v3618_v43, 0.0  ;;  %v1078_v24 = vsel %vm1029_vm3, %v3924_v23, 0.0  ;;  %3562 = vmatprep.subr.bf16.mxu0 %v3561_v18 }
 0x4b1   :  { %3519 = vmatmul.mubr.msk.f32.vlgmr.msra.gmra.mrb[30].mxu0 %vm1029_vm3, %v3618_v43  ;;  %3524 = vmatmul.mubr.msk.f32.vlgmr.msra.gmra.mrb[36].mxu1 %vm1029_vm3, %v3620_v45  ;;  %v2411_v47 = vsel %vm1029_vm3, %v3620_v45, 0.0 }
 0x4b2   :  { %2412 = vadd.xlane.f32.xlu0 %v2411_v47  ;;  %3564 = vmatpush3.bf16.msra.mxu0 %v3561_v18 }
 0x4b3   :  { %2403 = vadd.xlane.f32.xlu1 %v2402_v48  ;;  %3566 = vmatprep.subr.bf16.mxu0 %v3565_v21 }
 0x4b6   :  { %2391 = vadd.xlane.f32.xlu0 %v2390_v49  ;;  %3568 = vmatpush3.bf16.msra.mxu0 %v3565_v21 }
 0x4b7   :  { %2406 = vadd.xlane.f32.xlu1 %v2405_v51 }
 0x4bb   :  { %2409 = vadd.xlane.f32.xlu1 %v2408_v53 }
 0x4bf   :  { %1079 = vadd.xlane.f32.xlu1 %v1078_v24 }
 0x4d5   :  { %v1083_v54 = vpop.xlane.xlu0 %1082  ;;  %v1086_v56 = vpop.xlane.xlu1 %1085 }
 0x4d6   :  { %3621 = vrcp.f32 %v1083_v54 }
 0x4d7   :  { %3623 = vrcp.f32 %v1086_v56 }
 0x4d9   :  { %v1089_v57 = vpop.xlane.xlu0 %1088 }
 0x4da   :  { %3625 = vrcp.f32 %v1089_v57 }
 0x4dd   :  { %v1092_v59 = vpop.xlane.xlu0 %1091 }
 0x4de   :  { %3627 = vrcp.f32 %v1092_v59 }
 0x4e0   :  { %v3622_v60 = vpop.eup %3621 }
 0x4e1   :  { %v3624_v61 = vpop.eup %3623  ;;  %v1095_v35 = vpop.xlane.xlu0 %1094  ;;  %v1703_v44 = vmul.f32 %v3622_v60, %v4069_v8 }
 0x4e2   :  { %3629 = vrcp.f32 %v1095_v35  ;;  %v1704_v46 = vmul.f32 %v3624_v61, %v4071_v10 }
 0x4e3   :  { %1711 = vrot.lane.b32.xlu1 %v1703_v44, %s3742_s24 }
 0x4e4   :  { %v3626_v23 = vpop.eup %3625  ;;  %1715 = vrot.lane.b32.xlu0 %v1704_v46, %s3731_s23 }
 0x4e5   :  { %v1098_v62 = vpop.xlane.xlu0 %1097  ;;  %v1705_v63 = vmul.f32 %v3626_v23, %v4073_v12 }
 0x4e6   :  { %3631 = vrcp.f32 %v1098_v62 }
 0x4e7   :  { %1719 = vrot.lane.b32.xlu1 %v1705_v63, %s3743_s25 }
 0x4e8   :  { %v3628_v0 = vpop.eup %3627 }
 0x4e9   :  { %v1706_v50 = vmul.f32 %v3628_v0, %v4086_v29 }
 0x4eb   :  { %1723 = vrot.lane.b32.xlu1 %v1706_v50, %s3744_s26 }
 0x4ec   :  { %v3630_v8 = vpop.eup %3629 }
 0x4ed   :  { %v1707_v10 = vmul.f32 %v3630_v8, %v4075_v14 }
 0x4ef   :  { %1727 = vrot.lane.b32.xlu1 %v1707_v10, %s3745_s27 }
 0x4f0   :  { %v3632_v1 = vpop.eup %3631 }
 0x4f1   :  { %v1708_v2 = vmul.f32 %v3632_v1, %v4088_v31 }
 0x4f3   :  { %1731 = vrot.lane.b32.xlu1 %v1708_v2, %s3746_s28 }
 0x509   :  { %v2395_v12 = vpop.xlane.xlu0 %2394 }
 0x50a   :  { %3633 = vrcp.f32 %v2395_v12 }
 0x50d   :  { %v1101_v52 = vpop.xlane.xlu0 %1100 }
 0x50e   :  { %3635 = vrcp.f32 %v1101_v52 }
 0x514   :  { %v3634_v29 = vpop.eup %3633 }
 0x518   :  { %v3636_v6 = vpop.eup %3635 }
 0x519   :  { %v1709_v14 = vmul.f32 %v3636_v6, %v4077_v16 }
 0x537   :  { %v2398_v7 = vpop.xlane.xlu1 %2397 }
 0x538   :  { %3637 = vrcp.f32 %v2398_v7 }
 0x53c   :  { %v2401_v31 = vpop.xlane.xlu1 %2400 }
 0x53d   :  { %3639 = vrcp.f32 %v2401_v31 }
 0x53f   :  { %v2413_v58 = vpop.xlane.xlu0 %2412 }
 0x540   :  { %v2404_v37 = vpop.xlane.xlu1 %2403 }
 0x541   :  { %3641 = vrcp.f32 %v2404_v37 }
 0x542   :  { %3643 = vrcp.f32 %v2413_v58  ;;  %v3638_v19 = vpop.eup %3637 }
 0x543   :  { %v2392_v46 = vpop.xlane.xlu0 %2391 }
 0x544   :  { %v2407_v11 = vpop.xlane.xlu1 %2406 }
 0x545   :  { %3645 = vrcp.f32 %v2407_v11 }
 0x547   :  { %v3640_v33 = vpop.eup %3639 }
 0x548   :  { %v2410_v32 = vpop.xlane.xlu1 %2409 }
 0x549   :  { %3647 = vrcp.f32 %v2410_v32 }
 0x54b   :  { %v3642_v40 = vpop.eup %3641 }
 0x54c   :  { %v3644_v41 = vpop.eup %3643  ;;  %v1080_v56 = vpop.xlane.xlu1 %1079 }
 0x54d   :  { %3649 = vrcp.f32 %v1080_v56 }
 0x54e   :  { %v2556_v3 = vpop.f32.mrb[30].mxu1  ;;  %3651 = vrcp.f32 %v2392_v46 }
 0x54f   :  { %v3015_v4 = vmul.f32 %v3634_v29, %v2556_v3  ;;  %v3495_v5 = vpop.f32.mrb[31].mxu1  ;;  %v3646_v51 = vpop.eup %3645 }
 0x551   :  { %3023 = vrot.lane.b32.xlu1 %v3015_v4, %s3742_s24 }
 0x553   :  { %v3648_v24 = vpop.eup %3647 }
 0x555   :  { %1735 = vrot.lane.b32.xlu1 %v1709_v14, %s3747_s29  ;;  %v1712_v57 = vpop.permute.xlu1 %1711 }
 0x556   :  { %v1716_v63 = vpop.permute.xlu0 %1715 }
 0x557   :  { %v3650_v61 = vpop.eup %3649 }
 0x558   :  { %v1702_v44 = vmul.f32 %v3650_v61, %v4067_v38  ;;  %v3652_v4 = vpop.eup %3651 }
 0x559   :  { %v1720_v59 = vpop.permute.xlu1 %1719 }
 0x55a   :  { %v1738_v23 = vsel %vm436_vm2, %v1702_v44, %v1712_v57 }
 0x55b   :  { %v1739_v0 = vsel %vm1029_vm3, %v1738_v23, %v1716_v63 }
 0x55c   :  { %v1741_v8 = vsel %vm1740_vm4, %v1739_v0, %v1720_v59 }
 0x55d   :  { %v1724_v60 = vpop.permute.xlu1 %1723 }
 0x55e   :  { %v1743_v10 = vsel %vm1742_vm5, %v1741_v8, %v1724_v60 }
 0x561   :  { %v1728_v35 = vpop.permute.xlu1 %1727 }
 0x562   :  { %v1745_v1 = vsel %vm1744_vm6, %v1743_v10, %v1728_v35 }
 0x565   :  { %v1732_v62 = vpop.permute.xlu1 %1731 }
 0x566   :  { %v1747_v38 = vsel %vm1746_vm7, %v1745_v1, %v1732_v62 }
 0x577   :  { %v4168_v9 = vpop.f32.mrb[24].mxu0 }
 0x578   :  { %v3490_v13 = vpop.f32.mrb[25].mxu0  ;;  %v3014_v5 = vmul.f32 %v3652_v4, %v4168_v9  ;;  %v3242_v9 = vld [vmem:[%s4216_s2 + $0x3] ss:$0 sm:$0xff]  ;;  %s3701_s2 = scalar_lea.vmem %s3170_s6, 256 }
 0x579   :  { %p3702_p2 = scmp.ne.s32.totalorder %s3170_s6, %s3701_s2  ;;  %p3707_p4 = scmp.lt.s32.totalorder %s3701_s2, %s3701_s2 }
 0x57b   :  { %v2629_v16 = vpop.f32.mrb[26].mxu0  ;;  %p3708_p5 = por %p3707_p4, %p3706_p3 }
 0x57c   :  { %v3016_v55 = vmul.f32 %v3638_v19, %v2629_v16  ;;  %v2702_v20 = vpop.f32.mrb[32].mxu1  ;;  %v3500_v22 = vpop.f32.mrb[27].mxu0 }
 0x57d   :  { %v3505_v26 = vpop.f32.mrb[33].mxu1  ;;  %v3017_v25 = vmul.f32 %v3640_v33, %v2702_v20  ;;  %p3709_p6 = pnand %p3708_p5, %p3702_p2 }
 0x57e   :  { %3027 = vrot.lane.b32.xlu0 %v3016_v55, %s3731_s23 }
 0x580   :  { %v2775_v34 = vpop.f32.mrb[28].mxu0  ;;  %v2848_v27 = vpop.f32.mrb[34].mxu1 }
 0x581   :  { %v3510_v36 = vpop.f32.mrb[29].mxu0  ;;  %v3515_v39 = vpop.f32.mrb[35].mxu1  ;;  %v3018_v42 = vmul.f32 %v3642_v40, %v2775_v34  ;;  %v3019_v53 = vmul.f32 %v3646_v51, %v2848_v27 }
 0x582   :  { %3031 = vrot.lane.b32.xlu0 %v3017_v25, %s3743_s25 }
 0x584   :  { %v2921_v43 = vpop.f32.mrb[30].mxu0  ;;  %v2994_v45 = vpop.f32.mrb[36].mxu1 }
 0x585   :  { %v3021_v47 = vmul.f32 %v3644_v41, %v2994_v45  ;;  %v3520_v48 = vpop.f32.mrb[31].mxu0  ;;  %v3525_v49 = vpop.f32.mrb[37].mxu1  ;;  %v3020_v54 = vmul.f32 %v3648_v24, %v2921_v43 }
 0x586   :  { %3035 = vrot.lane.b32.xlu0 %v3018_v42, %s3744_s26 }
 0x587   :  { %3047 = vrot.lane.b32.xlu1 %v3021_v47, %s3747_s29 }
 0x58a   :  { %3039 = vrot.lane.b32.xlu0 %v3019_v53, %s3745_s27 }
 0x58e   :  { %3043 = vrot.lane.b32.xlu0 %v3020_v54, %s3746_s28 }
 0x5c3   :  { %v3024_v50 = vpop.permute.xlu1 %3023 }
 0x5c4   :  { %v3050_v6 = vsel %vm436_vm2, %v3014_v5, %v3024_v50 }
 0x5c7   :  { %v1736_v2 = vpop.permute.xlu1 %1735 }
 0x5c8   :  { %v1749_v12 = vsel %vm1748_vm8, %v1747_v38, %v1736_v2 }
 0x5c9   :  { %3534 = vmatprep.mubr.msk.f32.mxu0 %vm56_vm0, %v1749_v12 }
 0x5f0   :  { %v3028_v52 = vpop.permute.xlu0 %3027 }
 0x5f1   :  { %v3051_v7 = vsel %vm1029_vm3, %v3050_v6, %v3028_v52 }
 0x5f4   :  { %v3032_v29 = vpop.permute.xlu0 %3031 }
 0x5f5   :  { %v3052_v31 = vsel %vm1740_vm4, %v3051_v7, %v3032_v29 }
 0x5f8   :  { %v3036_v3 = vpop.permute.xlu0 %3035 }
 0x5f9   :  { %v3053_v37 = vsel %vm1742_vm5, %v3052_v31, %v3036_v3  ;;  %v3048_v13 = vpop.permute.xlu1 %3047 }
 0x5fc   :  { %v3040_v14 = vpop.permute.xlu0 %3039 }
 0x5fd   :  { %v3054_v58 = vsel %vm1744_vm6, %v3053_v37, %v3040_v14 }
 0x600   :  { %v3044_v11 = vpop.permute.xlu0 %3043 }
 0x601   :  { %v3055_v15 = vsel %vm1746_vm7, %v3054_v58, %v3044_v11 }
 0x602   :  { %v3056_v17 = vsel %vm1748_vm8, %v3055_v15, %v3048_v13 }
 0x603   :  { %3535 = vmatmul.mubr.msk.f32.vlgmr.msra.gmra.mrb[32].mxu0 %vm56_vm0, %v3056_v17 }
 0x6d6   :  { %v3536_v18 = vpop.f32.mrb[32].mxu0 }
 0x6d7   :  { %v3148_v19 = vadd.f32 %v3536_v18, %v3242_v9  ;;  %v3142_v16 = vpop.f32.mrb[33].mxu0 }
 0x6d8   :  { %v3143_v55 = vadd.f32 %v3242_v9, %v3142_v16 }
 0x6d9   :  { %v3155_v20 = vmul.f32 0.70710677, %v3148_v19  ;;  %v3152_v30 = vmul.f32 0.5, %v3148_v19 }
 0x6da   :  { %v3154_v22 = vmul.f32 0.70710677, %v3143_v55  ;;  %v3151_v21 = vmul.f32 0.5, %v3143_v55 }
 0x6db   :  { %3653 = verf.f32 %v3155_v20 }
 0x6dc   :  { %3655 = verf.f32 %v3154_v22 }
 0x6e5   :  { %v3654_v26 = vpop.eup %3653 }
 0x6e6   :  { %v3656_v28 = vpop.eup %3655  ;;  %v3159_v32 = vadd.f32 1.0, %v3654_v26 }
 0x6e7   :  { %v3158_v33 = vadd.f32 1.0, %v3656_v28 }
 0x6e8   :  { %v3161_v25 = vmul.f32 %v3159_v32, %v3152_v30 }
 0x6e9   :  { %v3160_v34 = vmul.f32 %v3158_v33, %v3151_v21 }
 0x6ea   :  { %3163 = vst.msk [vmem:[#allocation7 + $0x8] sm:$0xff] %vm56_vm0, %v3161_v25 }
 0x6eb   :  { %3162 = vst.msk [vmem:[#allocation7] sm:$0xff] %vm56_vm0, %v3160_v34 }
 0x6ec   :  { %3712 = shalt.err (!%p3709_p6)
}
 0x6ed   :  { %s3713_s0 = scalar_lea.hbm %s4217_s3, 256 }
 0x6ee   :  { %p3714_p7 = scmp.ne.s32.totalorder %s4217_s3, %s3713_s0  ;;  %p3717_p8 = scmp.lt.u32.totalorder %s3713_s0, %s4217_s3 }
 0x6f0   :  { %p3719_p9 = pnand %p3717_p8, %p3714_p7 }
 0x6f2   :  { %3722 = shalt.err (!%p3719_p9)
}
 0x6f3   :  { %3175 = dma.vmem_to_hbm [thread:$0]  %s3170_s6, 256, %s4217_s3, [#allocation4], %s3730_s22, %s3730_s22, %s3731_s23  }
 0x6f4   :  { %3727 = dma.done.wait [#allocation4], 256  }
 0x6f5   :  { %3728 = vsyncadd [#allocation4], 4294967040 }
 0x6f6   :  { %3179 = vsyncpa [#allocation3], 1 }
 0x6f7   :  { %3180 = vsyncpa [#allocation6], 1 }
 0x6f8   :  { %3181 = vsyncpa [#allocation4], 1 }

</bundles_post_ra>
